<compile_context>
chip_gen: v5e
topology: v5e:2x2
jax: 0.10.0
libtpu: 0.0.40
codegen_flags: <defaults>
</compile_context>

<pallas_src>
import math
from functools import partial

import jax
import jax.numpy as jnp
from jax.experimental import pallas as pl
from jax.experimental.pallas import tpu as pltpu


# -------------------------------------------------------------------------
# exact GELU (erf-based, like PyTorch nn.GELU default). Abramowitz-Stegun
# 7.1.26 rational approximation of erf (max abs err ~1.5e-7); the divide goes
# to the EUP via pl.reciprocal(approx=True).
# -------------------------------------------------------------------------
def _erf_poly(x):
    a1, a2, a3, a4, a5 = (0.254829592, -0.284496736, 1.421413741,
                          -1.453152027, 1.061405429)
    p = 0.3275911
    sgn = jnp.where(x >= 0.0, 1.0, -1.0)
    ax = jnp.abs(x)
    t = pl.reciprocal(1.0 + p * ax, approx=True)
    poly = ((((a5 * t + a4) * t + a3) * t + a2) * t + a1) * t
    y = 1.0 - poly * jnp.exp(-ax * ax)
    return sgn * y


def _gelu_exact(x):
    return 0.5 * x * (1.0 + _erf_poly(x * 0.7071067811865476))


def _mlp_block(x, w_ref, b_ref, g_ref, beta_ref):
    """Linear(bias) -> LayerNorm(eps=1e-5, affine) -> GELU, on 2-D rows."""
    y = jnp.dot(x, w_ref[...], preferred_element_type=jnp.float32) + b_ref[...]
    mean = jnp.mean(y, axis=-1, keepdims=True)
    var = jnp.mean((y - mean) ** 2, axis=-1, keepdims=True)
    yn = (y - mean) * jax.lax.rsqrt(var + 1e-5)
    yn = yn * g_ref[...] + beta_ref[...]
    return _gelu_exact(yn)


# -------------------------------------------------------------------------
# Hoisted, batch-invariant query projection: (lq @ wq + bq) * 1/sqrt(head_dim)
# Runs exactly once per forward (one-shot pallas_call, full arrays in VMEM).
# -------------------------------------------------------------------------
def q_proj_kernel(lq_ref, wq_ref, bq_ref, o_ref, *, scale):
    q = jnp.dot(lq_ref[...], wq_ref[...],
                preferred_element_type=jnp.float32) + bq_ref[...]
    o_ref[...] = q * scale


# -------------------------------------------------------------------------
# Fused kernel: per batch tile of tile_b elements (tile_b*S rows)
#   MLP1 -> MLP2 -> K,V projections (dense 2-D matmuls over tile_b*S rows)
#   then per batch element (static loop, tile-aligned sublane slices):
#     scores  = q_stack @ K_b^T        (q_stack is block-diagonal per head)
#     softmax (approx reciprocal)
#     ctx_all = P @ V_b                (dense; head selection via mask)
#     ctx     = sel @ (ctx_all * head_mask)   -> concat-head (L, E) context
#     out_b   = ctx @ Wo + bo
# -------------------------------------------------------------------------
def fused_lq_encoder_kernel(x_ref, w1_ref, b1_ref, g1_ref, be1_ref,
                            w2_ref, b2_ref, g2_ref, be2_ref,
                            wk_ref, bk_ref, wv_ref, bv_ref,
                            qs_ref, hm_ref, sel_ref, wo_ref, bo_ref,
                            o_ref, *, tile_b, seq_len):
    x = x_ref[...]                                         # (tile_b*S, c_in)
    h = _mlp_block(x, w1_ref, b1_ref, g1_ref, be1_ref)     # (tile_b*S, E)
    h = _mlp_block(h, w2_ref, b2_ref, g2_ref, be2_ref)     # (tile_b*S, E)

    k = jnp.dot(h, wk_ref[...], preferred_element_type=jnp.float32) + bk_ref[...]
    v = jnp.dot(h, wv_ref[...], preferred_element_type=jnp.float32) + bv_ref[...]

    qs = qs_ref[...]            # (H*L, E)  head-stacked, pre-scaled queries
    hm = hm_ref[...]            # (H*L, E)  0/1 head mask
    sel = sel_ref[...]          # (L, H*L)  0/1 head-sum selection matrix
    wo = wo_ref[...]            # (E, E)
    bo = bo_ref[...]            # (1, E)

    for b in range(tile_b):                                # static unroll
        kb = k[b * seq_len:(b + 1) * seq_len, :]           # (S, E)
        vb = v[b * seq_len:(b + 1) * seq_len, :]           # (S, E)
        s = jnp.dot(qs, kb.T, preferred_element_type=jnp.float32)   # (H*L, S)
        s = s - jnp.max(s, axis=-1, keepdims=True)
        p = jnp.exp(s)
        p = p * pl.reciprocal(jnp.sum(p, axis=-1, keepdims=True), approx=True)
        ctx_all = jnp.dot(p, vb, preferred_element_type=jnp.float32)  # (H*L, E)
        ctx = jnp.dot(sel, ctx_all * hm,
                      preferred_element_type=jnp.float32)             # (L, E)
        o_ref[b] = jnp.dot(ctx, wo, preferred_element_type=jnp.float32) + bo


# -------------------------------------------------------------------------
# Wrapper: one tiny q-projection call + one fused call over batch tiles.
# The head-stacking / masks are constant 0/1 layout plumbing built in the
# wrapper (no per-batch compute).
# -------------------------------------------------------------------------
def lq_encoder_forward(x, p, *, num_head, batch_tile=8):
    B, S, c_in = x.shape
    E = p["w1"].shape[1]
    L = p["lq"].shape[0]
    hd = E // num_head
    scale = 1.0 / math.sqrt(hd)

    # largest batch tile that divides B, keeps row blocks 8-aligned (or grid=1)
    tb = 1
    for d in range(1, min(B, batch_tile) + 1):
        if B % d == 0 and (d == B or (d * S) % 8 == 0):
            tb = d

    # hoisted, batch-invariant query projection (runs once)
    q_scaled = pl.pallas_call(
        partial(q_proj_kernel, scale=scale),
        out_shape=jax.ShapeDtypeStruct((L, E), jnp.float32),
    )(p["lq"], p["wq"], p["bq"])

    # constant head-structure matrices (layout plumbing, built once)
    row_head = jnp.arange(num_head * L) // L               # (H*L,)
    col_head = jnp.arange(E) // hd                         # (E,)
    hm = (row_head[:, None] == col_head[None, :]).astype(jnp.float32)   # (H*L,E)
    qstack = hm * jnp.tile(q_scaled, (num_head, 1))                      # (H*L,E)
    sel = (jnp.arange(L)[:, None] ==
           (jnp.arange(num_head * L) % L)[None, :]).astype(jnp.float32)  # (L,H*L)

    x2d = x.reshape(B * S, c_in)
    kernel = partial(fused_lq_encoder_kernel, tile_b=tb, seq_len=S)
    full = lambda i: (0, 0)

    return pl.pallas_call(
        kernel,
        out_shape=jax.ShapeDtypeStruct((B, L, E), jnp.float32),
        grid=(B // tb,),
        in_specs=[
            pl.BlockSpec((tb * S, c_in), lambda i: (i, 0)),   # x rows
            pl.BlockSpec((c_in, E), full), pl.BlockSpec((1, E), full),  # mlp1
            pl.BlockSpec((1, E), full), pl.BlockSpec((1, E), full),
            pl.BlockSpec((E, E), full), pl.BlockSpec((1, E), full),     # mlp2
            pl.BlockSpec((1, E), full), pl.BlockSpec((1, E), full),
            pl.BlockSpec((E, E), full), pl.BlockSpec((1, E), full),     # wk, bk
            pl.BlockSpec((E, E), full), pl.BlockSpec((1, E), full),     # wv, bv
            pl.BlockSpec((num_head * L, E), full),                      # qstack
            pl.BlockSpec((num_head * L, E), full),                      # head mask
            pl.BlockSpec((L, num_head * L), full),                      # sel
            pl.BlockSpec((E, E), full), pl.BlockSpec((1, E), full),     # wo, bo
        ],
        out_specs=pl.BlockSpec((tb, L, E), lambda i: (i, 0, 0)),
        compiler_params=pltpu.CompilerParams(
            dimension_semantics=("parallel",),
            vmem_limit_bytes=32 * 1024 * 1024,
        ),
    )(x2d, p["w1"], p["b1"], p["g1"], p["be1"],
      p["w2"], p["b2"], p["g2"], p["be2"],
      p["wk"], p["bk"], p["wv"], p["bv"],
      qstack, hm, sel, p["wo"], p["bo"])


# -------------------------------------------------------------------------
# Pure-JAX reference (same math, used only for a numerical sanity check).
# -------------------------------------------------------------------------
def reference_forward(x, p, *, num_head):
    def mlp(h, w, b, g, beta):
        y = h @ w + b
        m = y.mean(-1, keepdims=True)
        v = ((y - m) ** 2).mean(-1, keepdims=True)
        yn = (y - m) / jnp.sqrt(v + 1e-5) * g + beta
        return 0.5 * yn * (1.0 + jax.lax.erf(yn * 0.7071067811865476))

    h = mlp(x, p["w1"], p["b1"], p["g1"], p["be1"])
    h = mlp(h, p["w2"], p["b2"], p["g2"], p["be2"])

    B, S, E = h.shape
    L = p["lq"].shape[0]
    hd = E // num_head
    q = jnp.broadcast_to((p["lq"] @ p["wq"] + p["bq"])[None], (B, L, E))
    k = h @ p["wk"] + p["bk"]
    v = h @ p["wv"] + p["bv"]
    qh = q.reshape(B, L, num_head, hd).transpose(0, 2, 1, 3)
    kh = k.reshape(B, S, num_head, hd).transpose(0, 2, 1, 3)
    vh = v.reshape(B, S, num_head, hd).transpose(0, 2, 1, 3)
    s = jnp.einsum("bhld,bhsd->bhls", qh, kh) / math.sqrt(hd)
    a = jax.nn.softmax(s, axis=-1)
    ctx = jnp.einsum("bhls,bhsd->bhld", a, vh)
    ctx = ctx.transpose(0, 2, 1, 3).reshape(B, L, E)
    return ctx @ p["wo"] + p["bo"]


if __name__ == "__main__":
    B, S = 2, 8
    c_in, c_out, num_lq, num_head = 16, 32, 4, 4
    f32 = jnp.float32

    ks = jax.random.split(jax.random.PRNGKey(0), 18)
    x = jax.random.normal(ks[0], (B, S, c_in), f32)

    def dense(key, fan_in, shape):
        return jax.random.normal(key, shape, f32) * (1.0 / math.sqrt(fan_in))

    params = {
        # mlp1: Linear(c_in -> c_out, bias) + LayerNorm(c_out) affine
        "w1": dense(ks[1], c_in, (c_in, c_out)),
        "b1": 0.1 * jax.random.normal(ks[2], (1, c_out), f32),
        "g1": 1.0 + 0.1 * jax.random.normal(ks[3], (1, c_out), f32),
        "be1": 0.1 * jax.random.normal(ks[4], (1, c_out), f32),
        # mlp2: Linear(c_out -> c_out, bias) + LayerNorm(c_out) affine
        "w2": dense(ks[5], c_out, (c_out, c_out)),
        "b2": 0.1 * jax.random.normal(ks[6], (1, c_out), f32),
        "g2": 1.0 + 0.1 * jax.random.normal(ks[7], (1, c_out), f32),
        "be2": 0.1 * jax.random.normal(ks[8], (1, c_out), f32),
        # LQBlock: learned queries (torch.rand ~ U[0,1)) + MHA in/out projections
        "lq": jax.random.uniform(ks[9], (num_lq, c_out), f32),
        "wq": dense(ks[10], c_out, (c_out, c_out)),
        "wk": dense(ks[11], c_out, (c_out, c_out)),
        "wv": dense(ks[12], c_out, (c_out, c_out)),
        "bq": 0.1 * jax.random.normal(ks[13], (1, c_out), f32),
        "bk": 0.1 * jax.random.normal(ks[14], (1, c_out), f32),
        "bv": 0.1 * jax.random.normal(ks[15], (1, c_out), f32),
        "wo": dense(ks[16], c_out, (c_out, c_out)) * 0.5,
        "bo": 0.1 * jax.random.normal(ks[17], (1, c_out), f32),
    }

    fwd = jax.jit(partial(lq_encoder_forward, num_head=num_head))
    out = fwd(x, params)
    jax.block_until_ready(out)
    assert out.shape == (B, num_lq, c_out)

    with jax.default_matmul_precision("float32"):
        ref = reference_forward(x, params, num_head=num_head)
    assert jnp.allclose(out, ref, atol=2e-2, rtol=2e-2), (
        float(jnp.max(jnp.abs(out - ref))))

    print("KERNEL_OK")
</pallas_src>

<mosaic_0001>
module attributes {stable_mosaic.version = 11 : i64} {
  func.func @q_proj_kernel(%arg0: memref<4x32xf32, #tpu.memory_space<vmem>>, %arg1: memref<32x32xf32, #tpu.memory_space<vmem>>, %arg2: memref<1x32xf32, #tpu.memory_space<vmem>>, %arg3: memref<4x32xf32, #tpu.memory_space<vmem>>) attributes {dimension_semantics = [], scalar_prefetch = 0 : i64, scratch_operands = 0 : i64, tpu.core_type = #tpu.core_type<tc>} {
    %c0 = arith.constant 0 : index
    %c0_0 = arith.constant 0 : index
    %0 = vector.load %arg0[%c0, %c0_0] : memref<4x32xf32, #tpu.memory_space<vmem>>, vector<4x32xf32>
    %c0_1 = arith.constant 0 : index
    %c0_2 = arith.constant 0 : index
    %1 = vector.load %arg1[%c0_1, %c0_2] : memref<32x32xf32, #tpu.memory_space<vmem>>, vector<32x32xf32>
    %cst = arith.constant dense<0.000000e+00> : vector<4x32xf32>
    %2 = tpu.matmul %0, %1, %cst {dimension_numbers = #tpu.dot_dimension_numbers<[1], [0], [0], [1], [0, 0, 1, 1], [], []>} : vector<4x32xf32>, vector<32x32xf32>, vector<4x32xf32> -> vector<4x32xf32>
    %c0_3 = arith.constant 0 : index
    %c0_4 = arith.constant 0 : index
    %3 = vector.load %arg2[%c0_3, %c0_4] : memref<1x32xf32, #tpu.memory_space<vmem>>, vector<1x32xf32>
    %4 = vector.broadcast %3 : vector<1x32xf32> to vector<4x32xf32>
    %5 = arith.addf %2, %4 : vector<4x32xf32>
    %cst_5 = arith.constant 0.353553385 : f32
    %6 = vector.broadcast %cst_5 : f32 to vector<4x32xf32>
    %7 = arith.mulf %5, %6 : vector<4x32xf32>
    %c0_6 = arith.constant 0 : index
    %c0_7 = arith.constant 0 : index
    %8 = vector.load %arg3[%c0_6, %c0_7] : memref<4x32xf32, #tpu.memory_space<vmem>>, vector<4x32xf32>
    tpu.vector_store %arg3[%c0_6, %c0_7], %7 {strides = array<i32>} : memref<4x32xf32, #tpu.memory_space<vmem>>, vector<4x32xf32>,
    return
  }
}

module attributes {stable_mosaic.version = 11 : i64} {
  func.func @fused_lq_encoder_kernel(%arg0: i32, %arg1: memref<16x16xf32, #tpu.memory_space<vmem>>, %arg2: memref<16x32xf32, #tpu.memory_space<vmem>>, %arg3: memref<1x32xf32, #tpu.memory_space<vmem>>, %arg4: memref<1x32xf32, #tpu.memory_space<vmem>>, %arg5: memref<1x32xf32, #tpu.memory_space<vmem>>, %arg6: memref<32x32xf32, #tpu.memory_space<vmem>>, %arg7: memref<1x32xf32, #tpu.memory_space<vmem>>, %arg8: memref<1x32xf32, #tpu.memory_space<vmem>>, %arg9: memref<1x32xf32, #tpu.memory_space<vmem>>, %arg10: memref<32x32xf32, #tpu.memory_space<vmem>>, %arg11: memref<1x32xf32, #tpu.memory_space<vmem>>, %arg12: memref<32x32xf32, #tpu.memory_space<vmem>>, %arg13: memref<1x32xf32, #tpu.memory_space<vmem>>, %arg14: memref<16x32xf32, #tpu.memory_space<vmem>>, %arg15: memref<16x32xf32, #tpu.memory_space<vmem>>, %arg16: memref<4x16xf32, #tpu.memory_space<vmem>>, %arg17: memref<32x32xf32, #tpu.memory_space<vmem>>, %arg18: memref<1x32xf32, #tpu.memory_space<vmem>>, %arg19: memref<2x4x32xf32, #tpu.memory_space<vmem>>) attributes {dimension_semantics = [#tpu.dimension_semantics<parallel>], iteration_bounds = array<i64: 1>, scalar_prefetch = 0 : i64, scratch_operands = 0 : i64, tpu.core_type = #tpu.core_type<tc>, window_params = [{transform_indices = @transform_0, window_bounds = array<i64: 16, 16>}, {pipeline_mode = #tpu.pipeline_mode<synchronous>, transform_indices = @transform_1, window_bounds = array<i64: 16, 32>}, {pipeline_mode = #tpu.pipeline_mode<synchronous>, transform_indices = @transform_2, window_bounds = array<i64: 1, 32>}, {pipeline_mode = #tpu.pipeline_mode<synchronous>, transform_indices = @transform_3, window_bounds = array<i64: 1, 32>}, {pipeline_mode = #tpu.pipeline_mode<synchronous>, transform_indices = @transform_4, window_bounds = array<i64: 1, 32>}, {pipeline_mode = #tpu.pipeline_mode<synchronous>, transform_indices = @transform_5, window_bounds = array<i64: 32, 32>}, {pipeline_mode = #tpu.pipeline_mode<synchronous>, transform_indices = @transform_6, window_bounds = array<i64: 1, 32>}, {pipeline_mode = #tpu.pipeline_mode<synchronous>, transform_indices = @transform_7, window_bounds = array<i64: 1, 32>}, {pipeline_mode = #tpu.pipeline_mode<synchronous>, transform_indices = @transform_8, window_bounds = array<i64: 1, 32>}, {pipeline_mode = #tpu.pipeline_mode<synchronous>, transform_indices = @transform_9, window_bounds = array<i64: 32, 32>}, {pipeline_mode = #tpu.pipeline_mode<synchronous>, transform_indices = @transform_10, window_bounds = array<i64: 1, 32>}, {pipeline_mode = #tpu.pipeline_mode<synchronous>, transform_indices = @transform_11, window_bounds = array<i64: 32, 32>}, {pipeline_mode = #tpu.pipeline_mode<synchronous>, transform_indices = @transform_12, window_bounds = array<i64: 1, 32>}, {pipeline_mode = #tpu.pipeline_mode<synchronous>, transform_indices = @transform_13, window_bounds = array<i64: 16, 32>}, {pipeline_mode = #tpu.pipeline_mode<synchronous>, transform_indices = @transform_14, window_bounds = array<i64: 16, 32>}, {pipeline_mode = #tpu.pipeline_mode<synchronous>, transform_indices = @transform_15, window_bounds = array<i64: 4, 16>}, {pipeline_mode = #tpu.pipeline_mode<synchronous>, transform_indices = @transform_16, window_bounds = array<i64: 32, 32>}, {pipeline_mode = #tpu.pipeline_mode<synchronous>, transform_indices = @transform_17, window_bounds = array<i64: 1, 32>}, {transform_indices = @transform_18, window_bounds = array<i64: 2, 4, 32>}]} {
    %c0 = arith.constant 0 : index
    %c0_0 = arith.constant 0 : index
    %0 = vector.load %arg1[%c0, %c0_0] : memref<16x16xf32, #tpu.memory_space<vmem>>, vector<16x16xf32>
    %c0_1 = arith.constant 0 : index
    %c0_2 = arith.constant 0 : index
    %1 = vector.load %arg2[%c0_1, %c0_2] : memref<16x32xf32, #tpu.memory_space<vmem>>, vector<16x32xf32>
    %cst = arith.constant dense<0.000000e+00> : vector<16x32xf32>
    %2 = tpu.matmul %0, %1, %cst {dimension_numbers = #tpu.dot_dimension_numbers<[1], [0], [0], [1], [0, 0, 1, 1], [], []>} : vector<16x16xf32>, vector<16x32xf32>, vector<16x32xf32> -> vector<16x32xf32>
    %c0_3 = arith.constant 0 : index
    %c0_4 = arith.constant 0 : index
    %3 = vector.load %arg3[%c0_3, %c0_4] : memref<1x32xf32, #tpu.memory_space<vmem>>, vector<1x32xf32>
    %4 = vector.broadcast %3 : vector<1x32xf32> to vector<16x32xf32>
    %5 = arith.addf %2, %4 : vector<16x32xf32>
    %cst_5 = arith.constant dense<0.000000e+00> : vector<16xf32>
    %6 = vector.multi_reduction <add>, %5, %cst_5 [1] : vector<16x32xf32> to vector<16xf32>
    %7 = vector.shape_cast %6 : vector<16xf32> to vector<16x1xf32>
    %cst_6 = arith.constant 3.200000e+01 : f32
    %8 = vector.broadcast %cst_6 : f32 to vector<16x1xf32>
    %9 = arith.divf %7, %8 : vector<16x1xf32>
    %10 = vector.broadcast %9 : vector<16x1xf32> to vector<16x32xf32>
    %11 = arith.subf %5, %10 : vector<16x32xf32>
    %12 = arith.mulf %11, %11 : vector<16x32xf32>
    %cst_7 = arith.constant dense<0.000000e+00> : vector<16xf32>
    %13 = vector.multi_reduction <add>, %12, %cst_7 [1] : vector<16x32xf32> to vector<16xf32>
    %14 = vector.shape_cast %13 : vector<16xf32> to vector<16x1xf32>
    %cst_8 = arith.constant 3.200000e+01 : f32
    %15 = vector.broadcast %cst_8 : f32 to vector<16x1xf32>
    %16 = arith.divf %14, %15 : vector<16x1xf32>
    %17 = vector.broadcast %9 : vector<16x1xf32> to vector<16x32xf32>
    %18 = arith.subf %5, %17 : vector<16x32xf32>
    %cst_9 = arith.constant 9.99999974E-6 : f32
    %19 = vector.broadcast %cst_9 : f32 to vector<16x1xf32>
    %20 = arith.addf %16, %19 : vector<16x1xf32>
    %21 = math.rsqrt %20 : vector<16x1xf32>
    %22 = vector.broadcast %21 : vector<16x1xf32> to vector<16x32xf32>
    %23 = arith.mulf %18, %22 : vector<16x32xf32>
    %c0_10 = arith.constant 0 : index
    %c0_11 = arith.constant 0 : index
    %24 = vector.load %arg4[%c0_10, %c0_11] : memref<1x32xf32, #tpu.memory_space<vmem>>, vector<1x32xf32>
    %25 = vector.broadcast %24 : vector<1x32xf32> to vector<16x32xf32>
    %26 = arith.mulf %23, %25 : vector<16x32xf32>
    %c0_12 = arith.constant 0 : index
    %c0_13 = arith.constant 0 : index
    %27 = vector.load %arg5[%c0_12, %c0_13] : memref<1x32xf32, #tpu.memory_space<vmem>>, vector<1x32xf32>
    %28 = vector.broadcast %27 : vector<1x32xf32> to vector<16x32xf32>
    %29 = arith.addf %26, %28 : vector<16x32xf32>
    %cst_14 = arith.constant 5.000000e-01 : f32
    %30 = vector.broadcast %cst_14 : f32 to vector<16x32xf32>
    %31 = arith.mulf %30, %29 : vector<16x32xf32>
    %cst_15 = arith.constant 0.707106769 : f32
    %32 = vector.broadcast %cst_15 : f32 to vector<16x32xf32>
    %33 = arith.mulf %29, %32 : vector<16x32xf32>
    %cst_16 = arith.constant 0.000000e+00 : f32
    %34 = vector.broadcast %cst_16 : f32 to vector<16x32xf32>
    %35 = arith.cmpf oge, %33, %34 : vector<16x32xf32>
    %cst_17 = arith.constant 1.000000e+00 : f32
    %cst_18 = arith.constant -1.000000e+00 : f32
    %36 = vector.broadcast %cst_17 : f32 to vector<16x32xf32>
    %37 = vector.broadcast %cst_18 : f32 to vector<16x32xf32>
    %38 = arith.select %35, %36, %37 : vector<16x32xi1>, vector<16x32xf32>
    %39 = math.absf %33 : vector<16x32xf32>
    %cst_19 = arith.constant 0.327591091 : f32
    %40 = vector.broadcast %cst_19 : f32 to vector<16x32xf32>
    %41 = arith.mulf %40, %39 : vector<16x32xf32>
    %cst_20 = arith.constant 1.000000e+00 : f32
    %42 = vector.broadcast %cst_20 : f32 to vector<16x32xf32>
    %43 = arith.addf %42, %41 : vector<16x32xf32>
    %44 = tpu.reciprocal %43 {approx = true} : vector<16x32xf32> -> vector<16x32xf32>
    %cst_21 = arith.constant 1.06140542 : f32
    %45 = vector.broadcast %cst_21 : f32 to vector<16x32xf32>
    %46 = arith.mulf %45, %44 : vector<16x32xf32>
    %cst_22 = arith.constant -1.45315206 : f32
    %47 = vector.broadcast %cst_22 : f32 to vector<16x32xf32>
    %48 = arith.addf %46, %47 : vector<16x32xf32>
    %49 = arith.mulf %48, %44 : vector<16x32xf32>
    %cst_23 = arith.constant 1.42141378 : f32
    %50 = vector.broadcast %cst_23 : f32 to vector<16x32xf32>
    %51 = arith.addf %49, %50 : vector<16x32xf32>
    %52 = arith.mulf %51, %44 : vector<16x32xf32>
    %cst_24 = arith.constant -0.284496725 : f32
    %53 = vector.broadcast %cst_24 : f32 to vector<16x32xf32>
    %54 = arith.addf %52, %53 : vector<16x32xf32>
    %55 = arith.mulf %54, %44 : vector<16x32xf32>
    %cst_25 = arith.constant 0.254829586 : f32
    %56 = vector.broadcast %cst_25 : f32 to vector<16x32xf32>
    %57 = arith.addf %55, %56 : vector<16x32xf32>
    %58 = arith.mulf %57, %44 : vector<16x32xf32>
    %cst_26 = arith.constant 0.000000e+00 : f32
    %59 = vector.broadcast %cst_26 : f32 to vector<16x32xf32>
    %60 = arith.subf %59, %39 : vector<16x32xf32>
    %61 = arith.mulf %60, %39 : vector<16x32xf32>
    %62 = math.exp %61 : vector<16x32xf32>
    %63 = arith.mulf %58, %62 : vector<16x32xf32>
    %cst_27 = arith.constant 1.000000e+00 : f32
    %64 = vector.broadcast %cst_27 : f32 to vector<16x32xf32>
    %65 = arith.subf %64, %63 : vector<16x32xf32>
    %66 = arith.mulf %38, %65 : vector<16x32xf32>
    %cst_28 = arith.constant 1.000000e+00 : f32
    %67 = vector.broadcast %cst_28 : f32 to vector<16x32xf32>
    %68 = arith.addf %67, %66 : vector<16x32xf32>
    %69 = arith.mulf %31, %68 : vector<16x32xf32>
    %c0_29 = arith.constant 0 : index
    %c0_30 = arith.constant 0 : index
    %70 = vector.load %arg6[%c0_29, %c0_30] : memref<32x32xf32, #tpu.memory_space<vmem>>, vector<32x32xf32>
    %cst_31 = arith.constant dense<0.000000e+00> : vector<16x32xf32>
    %71 = tpu.matmul %69, %70, %cst_31 {dimension_numbers = #tpu.dot_dimension_numbers<[1], [0], [0], [1], [0, 0, 1, 1], [], []>} : vector<16x32xf32>, vector<32x32xf32>, vector<16x32xf32> -> vector<16x32xf32>
    %c0_32 = arith.constant 0 : index
    %c0_33 = arith.constant 0 : index
    %72 = vector.load %arg7[%c0_32, %c0_33] : memref<1x32xf32, #tpu.memory_space<vmem>>, vector<1x32xf32>
    %73 = vector.broadcast %72 : vector<1x32xf32> to vector<16x32xf32>
    %74 = arith.addf %71, %73 : vector<16x32xf32>
    %cst_34 = arith.constant dense<0.000000e+00> : vector<16xf32>
    %75 = vector.multi_reduction <add>, %74, %cst_34 [1] : vector<16x32xf32> to vector<16xf32>
    %76 = vector.shape_cast %75 : vector<16xf32> to vector<16x1xf32>
    %cst_35 = arith.constant 3.200000e+01 : f32
    %77 = vector.broadcast %cst_35 : f32 to vector<16x1xf32>
    %78 = arith.divf %76, %77 : vector<16x1xf32>
    %79 = vector.broadcast %78 : vector<16x1xf32> to vector<16x32xf32>
    %80 = arith.subf %74, %79 : vector<16x32xf32>
    %81 = arith.mulf %80, %80 : vector<16x32xf32>
    %cst_36 = arith.constant dense<0.000000e+00> : vector<16xf32>
    %82 = vector.multi_reduction <add>, %81, %cst_36 [1] : vector<16x32xf32> to vector<16xf32>
    %83 = vector.shape_cast %82 : vector<16xf32> to vector<16x1xf32>
    %cst_37 = arith.constant 3.200000e+01 : f32
    %84 = vector.broadcast %cst_37 : f32 to vector<16x1xf32>
    %85 = arith.divf %83, %84 : vector<16x1xf32>
    %86 = vector.broadcast %78 : vector<16x1xf32> to vector<16x32xf32>
    %87 = arith.subf %74, %86 : vector<16x32xf32>
    %cst_38 = arith.constant 9.99999974E-6 : f32
    %88 = vector.broadcast %cst_38 : f32 to vector<16x1xf32>
    %89 = arith.addf %85, %88 : vector<16x1xf32>
    %90 = math.rsqrt %89 : vector<16x1xf32>
    %91 = vector.broadcast %90 : vector<16x1xf32> to vector<16x32xf32>
    %92 = arith.mulf %87, %91 : vector<16x32xf32>
    %c0_39 = arith.constant 0 : index
    %c0_40 = arith.constant 0 : index
    %93 = vector.load %arg8[%c0_39, %c0_40] : memref<1x32xf32, #tpu.memory_space<vmem>>, vector<1x32xf32>
    %94 = vector.broadcast %93 : vector<1x32xf32> to vector<16x32xf32>
    %95 = arith.mulf %92, %94 : vector<16x32xf32>
    %c0_41 = arith.constant 0 : index
    %c0_42 = arith.constant 0 : index
    %96 = vector.load %arg9[%c0_41, %c0_42] : memref<1x32xf32, #tpu.memory_space<vmem>>, vector<1x32xf32>
    %97 = vector.broadcast %96 : vector<1x32xf32> to vector<16x32xf32>
    %98 = arith.addf %95, %97 : vector<16x32xf32>
    %cst_43 = arith.constant 5.000000e-01 : f32
    %99 = vector.broadcast %cst_43 : f32 to vector<16x32xf32>
    %100 = arith.mulf %99, %98 : vector<16x32xf32>
    %cst_44 = arith.constant 0.707106769 : f32
    %101 = vector.broadcast %cst_44 : f32 to vector<16x32xf32>
    %102 = arith.mulf %98, %101 : vector<16x32xf32>
    %cst_45 = arith.constant 0.000000e+00 : f32
    %103 = vector.broadcast %cst_45 : f32 to vector<16x32xf32>
    %104 = arith.cmpf oge, %102, %103 : vector<16x32xf32>
    %cst_46 = arith.constant 1.000000e+00 : f32
    %cst_47 = arith.constant -1.000000e+00 : f32
    %105 = vector.broadcast %cst_46 : f32 to vector<16x32xf32>
    %106 = vector.broadcast %cst_47 : f32 to vector<16x32xf32>
    %107 = arith.select %104, %105, %106 : vector<16x32xi1>, vector<16x32xf32>
    %108 = math.absf %102 : vector<16x32xf32>
    %cst_48 = arith.constant 0.327591091 : f32
    %109 = vector.broadcast %cst_48 : f32 to vector<16x32xf32>
    %110 = arith.mulf %109, %108 : vector<16x32xf32>
    %cst_49 = arith.constant 1.000000e+00 : f32
    %111 = vector.broadcast %cst_49 : f32 to vector<16x32xf32>
    %112 = arith.addf %111, %110 : vector<16x32xf32>
    %113 = tpu.reciprocal %112 {approx = true} : vector<16x32xf32> -> vector<16x32xf32>
    %cst_50 = arith.constant 1.06140542 : f32
    %114 = vector.broadcast %cst_50 : f32 to vector<16x32xf32>
    %115 = arith.mulf %114, %113 : vector<16x32xf32>
    %cst_51 = arith.constant -1.45315206 : f32
    %116 = vector.broadcast %cst_51 : f32 to vector<16x32xf32>
    %117 = arith.addf %115, %116 : vector<16x32xf32>
    %118 = arith.mulf %117, %113 : vector<16x32xf32>
    %cst_52 = arith.constant 1.42141378 : f32
    %119 = vector.broadcast %cst_52 : f32 to vector<16x32xf32>
    %120 = arith.addf %118, %119 : vector<16x32xf32>
    %121 = arith.mulf %120, %113 : vector<16x32xf32>
    %cst_53 = arith.constant -0.284496725 : f32
    %122 = vector.broadcast %cst_53 : f32 to vector<16x32xf32>
    %123 = arith.addf %121, %122 : vector<16x32xf32>
    %124 = arith.mulf %123, %113 : vector<16x32xf32>
    %cst_54 = arith.constant 0.254829586 : f32
    %125 = vector.broadcast %cst_54 : f32 to vector<16x32xf32>
    %126 = arith.addf %124, %125 : vector<16x32xf32>
    %127 = arith.mulf %126, %113 : vector<16x32xf32>
    %cst_55 = arith.constant 0.000000e+00 : f32
    %128 = vector.broadcast %cst_55 : f32 to vector<16x32xf32>
    %129 = arith.subf %128, %108 : vector<16x32xf32>
    %130 = arith.mulf %129, %108 : vector<16x32xf32>
    %131 = math.exp %130 : vector<16x32xf32>
    %132 = arith.mulf %127, %131 : vector<16x32xf32>
    %cst_56 = arith.constant 1.000000e+00 : f32
    %133 = vector.broadcast %cst_56 : f32 to vector<16x32xf32>
    %134 = arith.subf %133, %132 : vector<16x32xf32>
    %135 = arith.mulf %107, %134 : vector<16x32xf32>
    %cst_57 = arith.constant 1.000000e+00 : f32
    %136 = vector.broadcast %cst_57 : f32 to vector<16x32xf32>
    %137 = arith.addf %136, %135 : vector<16x32xf32>
    %138 = arith.mulf %100, %137 : vector<16x32xf32>
    %c0_58 = arith.constant 0 : index
    %c0_59 = arith.constant 0 : index
    %139 = vector.load %arg10[%c0_58, %c0_59] : memref<32x32xf32, #tpu.memory_space<vmem>>, vector<32x32xf32>
    %cst_60 = arith.constant dense<0.000000e+00> : vector<16x32xf32>
    %140 = tpu.matmul %138, %139, %cst_60 {dimension_numbers = #tpu.dot_dimension_numbers<[1], [0], [0], [1], [0, 0, 1, 1], [], []>} : vector<16x32xf32>, vector<32x32xf32>, vector<16x32xf32> -> vector<16x32xf32>
    %c0_61 = arith.constant 0 : index
    %c0_62 = arith.constant 0 : index
    %141 = vector.load %arg11[%c0_61, %c0_62] : memref<1x32xf32, #tpu.memory_space<vmem>>, vector<1x32xf32>
    %142 = vector.broadcast %141 : vector<1x32xf32> to vector<16x32xf32>
    %143 = arith.addf %140, %142 : vector<16x32xf32>
    %c0_63 = arith.constant 0 : index
    %c0_64 = arith.constant 0 : index
    %144 = vector.load %arg12[%c0_63, %c0_64] : memref<32x32xf32, #tpu.memory_space<vmem>>, vector<32x32xf32>
    %cst_65 = arith.constant dense<0.000000e+00> : vector<16x32xf32>
    %145 = tpu.matmul %138, %144, %cst_65 {dimension_numbers = #tpu.dot_dimension_numbers<[1], [0], [0], [1], [0, 0, 1, 1], [], []>} : vector<16x32xf32>, vector<32x32xf32>, vector<16x32xf32> -> vector<16x32xf32>
    %c0_66 = arith.constant 0 : index
    %c0_67 = arith.constant 0 : index
    %146 = vector.load %arg13[%c0_66, %c0_67] : memref<1x32xf32, #tpu.memory_space<vmem>>, vector<1x32xf32>
    %147 = vector.broadcast %146 : vector<1x32xf32> to vector<16x32xf32>
    %148 = arith.addf %145, %147 : vector<16x32xf32>
    %c0_68 = arith.constant 0 : index
    %c0_69 = arith.constant 0 : index
    %149 = vector.load %arg14[%c0_68, %c0_69] : memref<16x32xf32, #tpu.memory_space<vmem>>, vector<16x32xf32>
    %c0_70 = arith.constant 0 : index
    %c0_71 = arith.constant 0 : index
    %150 = vector.load %arg15[%c0_70, %c0_71] : memref<16x32xf32, #tpu.memory_space<vmem>>, vector<16x32xf32>
    %c0_72 = arith.constant 0 : index
    %c0_73 = arith.constant 0 : index
    %151 = vector.load %arg16[%c0_72, %c0_73] : memref<4x16xf32, #tpu.memory_space<vmem>>, vector<4x16xf32>
    %c0_74 = arith.constant 0 : index
    %c0_75 = arith.constant 0 : index
    %152 = vector.load %arg17[%c0_74, %c0_75] : memref<32x32xf32, #tpu.memory_space<vmem>>, vector<32x32xf32>
    %c0_76 = arith.constant 0 : index
    %c0_77 = arith.constant 0 : index
    %153 = vector.load %arg18[%c0_76, %c0_77] : memref<1x32xf32, #tpu.memory_space<vmem>>, vector<1x32xf32>
    %154 = vector.extract_strided_slice %143 {offsets = [0, 0], sizes = [8, 32], strides = [1, 1]} : vector<16x32xf32> to vector<8x32xf32>
    %155 = vector.extract_strided_slice %148 {offsets = [0, 0], sizes = [8, 32], strides = [1, 1]} : vector<16x32xf32> to vector<8x32xf32>
    %156 = tpu.transpose %154, [1, 0] : vector<8x32xf32> -> vector<32x8xf32>
    %cst_78 = arith.constant dense<0.000000e+00> : vector<16x8xf32>
    %157 = tpu.matmul %149, %156, %cst_78 {dimension_numbers = #tpu.dot_dimension_numbers<[1], [0], [0], [1], [0, 0, 1, 1], [], []>} : vector<16x32xf32>, vector<32x8xf32>, vector<16x8xf32> -> vector<16x8xf32>
    %cst_79 = arith.constant dense<0xFF800000> : vector<16xf32>
    %158 = vector.multi_reduction <maximumf>, %157, %cst_79 [1] : vector<16x8xf32> to vector<16xf32>
    %159 = vector.shape_cast %158 : vector<16xf32> to vector<16x1xf32>
    %160 = vector.broadcast %159 : vector<16x1xf32> to vector<16x8xf32>
    %161 = arith.subf %157, %160 : vector<16x8xf32>
    %162 = math.exp %161 : vector<16x8xf32>
    %cst_80 = arith.constant dense<0.000000e+00> : vector<16xf32>
    %163 = vector.multi_reduction <add>, %162, %cst_80 [1] : vector<16x8xf32> to vector<16xf32>
    %164 = vector.shape_cast %163 : vector<16xf32> to vector<16x1xf32>
    %165 = tpu.reciprocal %164 {approx = true} : vector<16x1xf32> -> vector<16x1xf32>
    %166 = vector.broadcast %165 : vector<16x1xf32> to vector<16x8xf32>
    %167 = arith.mulf %162, %166 : vector<16x8xf32>
    %cst_81 = arith.constant dense<0.000000e+00> : vector<16x32xf32>
    %168 = tpu.matmul %167, %155, %cst_81 {dimension_numbers = #tpu.dot_dimension_numbers<[1], [0], [0], [1], [0, 0, 1, 1], [], []>} : vector<16x8xf32>, vector<8x32xf32>, vector<16x32xf32> -> vector<16x32xf32>
    %169 = arith.mulf %168, %150 : vector<16x32xf32>
    %cst_82 = arith.constant dense<0.000000e+00> : vector<4x32xf32>
    %170 = tpu.matmul %151, %169, %cst_82 {dimension_numbers = #tpu.dot_dimension_numbers<[1], [0], [0], [1], [0, 0, 1, 1], [], []>} : vector<4x16xf32>, vector<16x32xf32>, vector<4x32xf32> -> vector<4x32xf32>
    %cst_83 = arith.constant dense<0.000000e+00> : vector<4x32xf32>
    %171 = tpu.matmul %170, %152, %cst_83 {dimension_numbers = #tpu.dot_dimension_numbers<[1], [0], [0], [1], [0, 0, 1, 1], [], []>} : vector<4x32xf32>, vector<32x32xf32>, vector<4x32xf32> -> vector<4x32xf32>
    %172 = vector.broadcast %153 : vector<1x32xf32> to vector<4x32xf32>
    %173 = arith.addf %171, %172 : vector<4x32xf32>
    %c0_84 = arith.constant 0 : index
    %c0_85 = arith.constant 0 : index
    %c0_86 = arith.constant 0 : index
    %174 = vector.load %arg19[%c0_84, %c0_85, %c0_86] : memref<2x4x32xf32, #tpu.memory_space<vmem>>, vector<1x4x32xf32>
    %175 = vector.shape_cast %174 : vector<1x4x32xf32> to vector<4x32xf32>
    %176 = vector.shape_cast %173 : vector<4x32xf32> to vector<1x4x32xf32>
    tpu.vector_store %arg19[%c0_84, %c0_85, %c0_86], %176 {strides = array<i32>} : memref<2x4x32xf32, #tpu.memory_space<vmem>>, vector<1x4x32xf32>,
    %177 = vector.extract_strided_slice %143 {offsets = [8, 0], sizes = [8, 32], strides = [1, 1]} : vector<16x32xf32> to vector<8x32xf32>
    %178 = vector.extract_strided_slice %148 {offsets = [8, 0], sizes = [8, 32], strides = [1, 1]} : vector<16x32xf32> to vector<8x32xf32>
    %179 = tpu.transpose %177, [1, 0] : vector<8x32xf32> -> vector<32x8xf32>
    %cst_87 = arith.constant dense<0.000000e+00> : vector<16x8xf32>
    %180 = tpu.matmul %149, %179, %cst_87 {dimension_numbers = #tpu.dot_dimension_numbers<[1], [0], [0], [1], [0, 0, 1, 1], [], []>} : vector<16x32xf32>, vector<32x8xf32>, vector<16x8xf32> -> vector<16x8xf32>
    %cst_88 = arith.constant dense<0xFF800000> : vector<16xf32>
    %181 = vector.multi_reduction <maximumf>, %180, %cst_88 [1] : vector<16x8xf32> to vector<16xf32>
    %182 = vector.shape_cast %181 : vector<16xf32> to vector<16x1xf32>
    %183 = vector.broadcast %182 : vector<16x1xf32> to vector<16x8xf32>
    %184 = arith.subf %180, %183 : vector<16x8xf32>
    %185 = math.exp %184 : vector<16x8xf32>
    %cst_89 = arith.constant dense<0.000000e+00> : vector<16xf32>
    %186 = vector.multi_reduction <add>, %185, %cst_89 [1] : vector<16x8xf32> to vector<16xf32>
    %187 = vector.shape_cast %186 : vector<16xf32> to vector<16x1xf32>
    %188 = tpu.reciprocal %187 {approx = true} : vector<16x1xf32> -> vector<16x1xf32>
    %189 = vector.broadcast %188 : vector<16x1xf32> to vector<16x8xf32>
    %190 = arith.mulf %185, %189 : vector<16x8xf32>
    %cst_90 = arith.constant dense<0.000000e+00> : vector<16x32xf32>
    %191 = tpu.matmul %190, %178, %cst_90 {dimension_numbers = #tpu.dot_dimension_numbers<[1], [0], [0], [1], [0, 0, 1, 1], [], []>} : vector<16x8xf32>, vector<8x32xf32>, vector<16x32xf32> -> vector<16x32xf32>
    %192 = arith.mulf %191, %150 : vector<16x32xf32>
    %cst_91 = arith.constant dense<0.000000e+00> : vector<4x32xf32>
    %193 = tpu.matmul %151, %192, %cst_91 {dimension_numbers = #tpu.dot_dimension_numbers<[1], [0], [0], [1], [0, 0, 1, 1], [], []>} : vector<4x16xf32>, vector<16x32xf32>, vector<4x32xf32> -> vector<4x32xf32>
    %cst_92 = arith.constant dense<0.000000e+00> : vector<4x32xf32>
    %194 = tpu.matmul %193, %152, %cst_92 {dimension_numbers = #tpu.dot_dimension_numbers<[1], [0], [0], [1], [0, 0, 1, 1], [], []>} : vector<4x32xf32>, vector<32x32xf32>, vector<4x32xf32> -> vector<4x32xf32>
    %195 = vector.broadcast %153 : vector<1x32xf32> to vector<4x32xf32>
    %196 = arith.addf %194, %195 : vector<4x32xf32>
    %c1 = arith.constant 1 : index
    %c0_93 = arith.constant 0 : index
    %c0_94 = arith.constant 0 : index
    %197 = vector.load %arg19[%c1, %c0_93, %c0_94] : memref<2x4x32xf32, #tpu.memory_space<vmem>>, vector<1x4x32xf32>
    %198 = vector.shape_cast %197 : vector<1x4x32xf32> to vector<4x32xf32>
    %199 = vector.shape_cast %196 : vector<4x32xf32> to vector<1x4x32xf32>
    tpu.vector_store %arg19[%c1, %c0_93, %c0_94], %199 {strides = array<i32>} : memref<2x4x32xf32, #tpu.memory_space<vmem>>, vector<1x4x32xf32>,
    return
  }
  func.func @transform_0(%arg0: i32) -> (i32, i32) {
    %c0_i32 = arith.constant 0 : i32
    %c0_i32_0 = arith.constant 0 : i32
    return %arg0, %c0_i32 : i32, i32
  }
  func.func @transform_1(%arg0: i32) -> (i32, i32) {
    %c0_i32 = arith.constant 0 : i32
    %c0_i32_0 = arith.constant 0 : i32
    %c0_i32_1 = arith.constant 0 : i32
    return %c0_i32, %c0_i32_0 : i32, i32
  }
  func.func @transform_2(%arg0: i32) -> (i32, i32) {
    %c0_i32 = arith.constant 0 : i32
    %c0_i32_0 = arith.constant 0 : i32
    %c0_i32_1 = arith.constant 0 : i32
    return %c0_i32, %c0_i32_0 : i32, i32
  }
  func.func @transform_3(%arg0: i32) -> (i32, i32) {
    %c0_i32 = arith.constant 0 : i32
    %c0_i32_0 = arith.constant 0 : i32
    %c0_i32_1 = arith.constant 0 : i32
    return %c0_i32, %c0_i32_0 : i32, i32
  }
  func.func @transform_4(%arg0: i32) -> (i32, i32) {
    %c0_i32 = arith.constant 0 : i32
    %c0_i32_0 = arith.constant 0 : i32
    %c0_i32_1 = arith.constant 0 : i32
    return %c0_i32, %c0_i32_0 : i32, i32
  }
  func.func @transform_5(%arg0: i32) -> (i32, i32) {
    %c0_i32 = arith.constant 0 : i32
    %c0_i32_0 = arith.constant 0 : i32
    %c0_i32_1 = arith.constant 0 : i32
    return %c0_i32, %c0_i32_0 : i32, i32
  }
  func.func @transform_6(%arg0: i32) -> (i32, i32) {
    %c0_i32 = arith.constant 0 : i32
    %c0_i32_0 = arith.constant 0 : i32
    %c0_i32_1 = arith.constant 0 : i32
    return %c0_i32, %c0_i32_0 : i32, i32
  }
  func.func @transform_7(%arg0: i32) -> (i32, i32) {
    %c0_i32 = arith.constant 0 : i32
    %c0_i32_0 = arith.constant 0 : i32
    %c0_i32_1 = arith.constant 0 : i32
    return %c0_i32, %c0_i32_0 : i32, i32
  }
  func.func @transform_8(%arg0: i32) -> (i32, i32) {
    %c0_i32 = arith.constant 0 : i32
    %c0_i32_0 = arith.constant 0 : i32
    %c0_i32_1 = arith.constant 0 : i32
    return %c0_i32, %c0_i32_0 : i32, i32
  }
  func.func @transform_9(%arg0: i32) -> (i32, i32) {
    %c0_i32 = arith.constant 0 : i32
    %c0_i32_0 = arith.constant 0 : i32
    %c0_i32_1 = arith.constant 0 : i32
    return %c0_i32, %c0_i32_0 : i32, i32
  }
  func.func @transform_10(%arg0: i32) -> (i32, i32) {
    %c0_i32 = arith.constant 0 : i32
    %c0_i32_0 = arith.constant 0 : i32
    %c0_i32_1 = arith.constant 0 : i32
    return %c0_i32, %c0_i32_0 : i32, i32
  }
  func.func @transform_11(%arg0: i32) -> (i32, i32) {
    %c0_i32 = arith.constant 0 : i32
    %c0_i32_0 = arith.constant 0 : i32
    %c0_i32_1 = arith.constant 0 : i32
    return %c0_i32, %c0_i32_0 : i32, i32
  }
  func.func @transform_12(%arg0: i32) -> (i32, i32) {
    %c0_i32 = arith.constant 0 : i32
    %c0_i32_0 = arith.constant 0 : i32
    %c0_i32_1 = arith.constant 0 : i32
    return %c0_i32, %c0_i32_0 : i32, i32
  }
  func.func @transform_13(%arg0: i32) -> (i32, i32) {
    %c0_i32 = arith.constant 0 : i32
    %c0_i32_0 = arith.constant 0 : i32
    %c0_i32_1 = arith.constant 0 : i32
    return %c0_i32, %c0_i32_0 : i32, i32
  }
  func.func @transform_14(%arg0: i32) -> (i32, i32) {
    %c0_i32 = arith.constant 0 : i32
    %c0_i32_0 = arith.constant 0 : i32
    %c0_i32_1 = arith.constant 0 : i32
    return %c0_i32, %c0_i32_0 : i32, i32
  }
  func.func @transform_15(%arg0: i32) -> (i32, i32) {
    %c0_i32 = arith.constant 0 : i32
    %c0_i32_0 = arith.constant 0 : i32
    %c0_i32_1 = arith.constant 0 : i32
    return %c0_i32, %c0_i32_0 : i32, i32
  }
  func.func @transform_16(%arg0: i32) -> (i32, i32) {
    %c0_i32 = arith.constant 0 : i32
    %c0_i32_0 = arith.constant 0 : i32
    %c0_i32_1 = arith.constant 0 : i32
    return %c0_i32, %c0_i32_0 : i32, i32
  }
  func.func @transform_17(%arg0: i32) -> (i32, i32) {
    %c0_i32 = arith.constant 0 : i32
    %c0_i32_0 = arith.constant 0 : i32
    %c0_i32_1 = arith.constant 0 : i32
    return %c0_i32, %c0_i32_0 : i32, i32
  }
  func.func @transform_18(%arg0: i32) -> (i32, i32, i32) {
    %c0_i32 = arith.constant 0 : i32
    %c0_i32_0 = arith.constant 0 : i32
    %c0_i32_1 = arith.constant 0 : i32
    return %arg0, %c0_i32, %c0_i32_0 : i32, i32, i32
  }
}

</mosaic_0001>

<bundles_post_ra>
// kernel: lq_encoder_forward.2
= control target key start
LH: loop header
LB: loop body
LE: loop exit
PB: predicated region body
PF: predicated region fallthrough
CT: control target
= control target key end

     0   :  { %8 = vsyncpa [#allocation3], 0  ;;  %s219_s0 = inlined_call_operand.hbm [shape: f32[4,32], index: 0, kind: input, shape index: {}]   ;;  %s220_s1 = inlined_call_operand.hbm [shape: f32[32,32], index: 1, kind: input, shape index: {}]   ;;  %s221_s2 = inlined_call_operand.hbm [shape: f32[1,32], index: 2, kind: input, shape index: {}]   ;;  %s222_s3 = inlined_call_operand.vmem [shape: f32[4,32], index: 3, kind: output, shape index: {}]  }
   0x1   :  { %9 = vsyncpa [#allocation5], 0  ;;  %s25_s14 = sshll.u32 %s220_s1, 4  ;;  %s182_s15 = smov [#allocation4]   ;;  %s26_s14 = int_to_ptr.hbm [resolvable:$true] %s25_s14 }
   0x2   :  { %s27_s16 = sshll.u32 %s182_s15, 4  ;;  %s15_s19 = sshll.u32 %s219_s0, 4  ;;  %s28_s16 = int_to_ptr.vmem [resolvable:$true] %s27_s16  ;;  %s16_s19 = int_to_ptr.hbm [resolvable:$true] %s15_s19 }
   0x3   :  { %s183_s20 = smov 128   ;;  %s184_s21 = smov 8  }
   0x4   :  { %33 = dma.hbm_to_vmem [thread:$0]  %s26_s14, 512, %s28_s16, [#allocation5], %s183_s20, %s183_s20, %s184_s21  }
   0x5   :  { %s185_s22 = smov [#allocation2]   ;;  %s39_s26 = sshll.u32 %s221_s2, 4  ;;  %s40_s26 = int_to_ptr.hbm [resolvable:$true] %s39_s26 }
   0x6   :  { %s17_s23 = sshll.u32 %s185_s22, 4  ;;  %s186_s1 = smov [#allocation6]   ;;  %s18_s23 = int_to_ptr.vmem [resolvable:$true] %s17_s23 }
   0x7   :  { %20 = dma.hbm_to_vmem [thread:$0]  %s16_s19, 64, %s18_s23, [#allocation3]  }
   0x8   :  { %s41_s27 = sshll.u32 %s186_s1, 4  ;;  %s42_s27 = int_to_ptr.vmem [resolvable:$true] %s41_s27 }
   0x9   :  { %44 = dma.hbm_to_vmem [thread:$0]  %s40_s26, 16, %s42_s27, [#allocation5]  }
   0xa   :  { %178 = dma.done.wait [#allocation3], 64  }
   0xb   :  { %179 = vsyncadd [#allocation3], 4294967232 }
   0xc   :  { %180 = dma.done.wait [#allocation5], 528  }
   0xd   :  { %181 = vsyncadd [#allocation5], 4294966768  ;;  %v61_v0 = vld [vmem:[#allocation4 + $0x18] sm:$0xff]  ;;  %v60_v1 = vld [vmem:[#allocation4 + $0x10] sm:$0xff]  ;;  %vm66_vm0 = vcmask 261120   ;;  %vm91_vm1 = vcmask 257024  }
   0xe   :  { %82 = vmatpush.msra.mxu0 %v61_v0  ;;  %v59_v2 = vld [vmem:[#allocation4 + $0x8] sm:$0xff]  ;;  %v58_v3 = vld [vmem:[#allocation4] sm:$0xff]  ;;  %v57_v4 = vld [vmem:[#allocation2] sm:$0xf] }
   0xf   :  { %v105_v5 = vld [vmem:[#allocation6] ss:$0 sm:$0xff] }
  0x10   :  { %83 = vmatpush.msra.mxu0 %v60_v1 }
  0x12   :  { %84 = vmatpush.msra.mxu0 %v59_v2 }
  0x14   :  { %85 = vmatpush.msra.mxu0 %v58_v3 }
  0x15   :  { %99 = vmatmul.msk.f32.vlgmr.msra.gmra.mxu0 %vm66_vm0, %v57_v4 }
  0x92   :  { %v87_v6 = vpop.f32.mrf.mxu0 }
  0x93   :  { %v88_v7 = vadd.f32 %v105_v5, %v87_v6 }
  0x95   :  { %v90_v8 = vmul.f32 0.35355338, %v88_v7 }
  0x97   :  { %92 = vst.msk [vmem:[%s222_s3] sm:$0xf] %vm91_vm1, %v90_v8 }
  0x98   :  { %97 = vsyncpa [#allocation3], 1 }
  0x99   :  { %98 = vsyncpa [#allocation5], 1 }

// kernel: lq_encoder_forward.3
= control target key start
LH: loop header
LB: loop body
LE: loop exit
PB: predicated region body
PF: predicated region fallthrough
CT: control target
= control target key end

     0   :  { %s1536_s0 = inlined_call_operand.hbm [shape: f32[16,16], index: 0, kind: input, shape index: {}]   ;;  %s1537_s1 = inlined_call_operand.hbm [shape: f32[16,32], index: 1, kind: input, shape index: {}]   ;;  %s1538_s2 = inlined_call_operand.vmem [shape: f32[1,32], index: 2, kind: input, shape index: {}]   ;;  %s1539_s3 = inlined_call_operand.hbm [shape: f32[1,32], index: 3, kind: input, shape index: {}]   ;;  %s1540_s4 = inlined_call_operand.hbm [shape: f32[1,32], index: 4, kind: input, shape index: {}]   ;;  %s1541_s5 = inlined_call_operand.vmem [shape: f32[32,32], index: 5, kind: input, shape index: {}]   ;;  %s1542_s6 = inlined_call_operand.hbm [shape: f32[1,32], index: 6, kind: input, shape index: {}]   ;;  %s1543_s7 = inlined_call_operand.hbm [shape: f32[1,32], index: 7, kind: input, shape index: {}]   ;;  %s1544_s8 = inlined_call_operand.hbm [shape: f32[1,32], index: 8, kind: input, shape index: {}]   ;;  %s1545_s9 = inlined_call_operand.vmem [shape: f32[32,32], index: 9, kind: input, shape index: {}]   ;;  %s1546_s10 = inlined_call_operand.hbm [shape: f32[1,32], index: 10, kind: input, shape index: {}]   ;;  %s1547_s11 = inlined_call_operand.vmem [shape: f32[32,32], index: 11, kind: input, shape index: {}]   ;;  %s1548_s12 = inlined_call_operand.hbm [shape: f32[1,32], index: 12, kind: input, shape index: {}]   ;;  %s1549_s13 = inlined_call_operand.vmem [shape: f32[16,32], index: 13, kind: input, shape index: {}]   ;;  %s1550_s14 = inlined_call_operand.vmem [shape: f32[16,32], index: 14, kind: input, shape index: {}]   ;;  %s1551_s15 = inlined_call_operand.vmem [shape: f32[4,16], index: 15, kind: input, shape index: {}]   ;;  %s1552_s16 = inlined_call_operand.hbm [shape: f32[32,32], index: 16, kind: input, shape index: {}]   ;;  %s1553_s17 = inlined_call_operand.hbm [shape: f32[1,32], index: 17, kind: input, shape index: {}]   ;;  %s1554_s18 = inlined_call_operand.hbm [shape: f32[2,4,32], index: 18, kind: output, shape index: {}]  }
   0x1   :  { %1557 = sst [smem:[#allocation28_spill]] %s1536_s0 }
   0x2   :  { %1558 = sst [smem:[#allocation29_spill]] %s1537_s1 }
   0x3   :  { %1559 = sst [smem:[#allocation30_spill]] %s1538_s2 }
   0x4   :  { %23 = vsyncpa [#allocation3], 0 }
   0x5   :  { %24 = vsyncpa [#allocation6], 0 }
   0x6   :  { %25 = vsyncpa [#allocation9], 0 }
   0x7   :  { %26 = vsyncpa [#allocation12], 0 }
   0x8   :  { %27 = vsyncpa [#allocation15], 0 }
   0x9   :  { %28 = vsyncpa [#allocation18], 0 }
   0xa   :  { %29 = vsyncpa [#allocation4], 0  ;;  %s1560_s29 = sld [smem:[#allocation29_spill]]  ;;  %s1270_s0 = smov [#allocation5]  }
   0xb   :  { %s49_s19 = sshll.u32 %s1270_s0, 4  ;;  %s74_s21 = sshll.u32 %s1540_s4, 4  ;;  %s50_s19 = int_to_ptr.vmem [resolvable:$true] %s49_s19  ;;  %s75_s21 = int_to_ptr.hbm [resolvable:$true] %s74_s21 }
   0xc   :  { %s1555_s22 = smov 128   ;;  %s1272_s2 = smov 8  }
   0xd   :  { %s1273_s23 = smov [#allocation8]   ;;  %s98_s27 = sshll.u32 %s1543_s7, 4  ;;  %s99_s27 = int_to_ptr.hbm [resolvable:$true] %s98_s27 }
   0xe   :  { %s76_s24 = sshll.u32 %s1273_s23, 4  ;;  %s122_s4 = sshll.u32 %s1546_s10, 4  ;;  %s77_s24 = int_to_ptr.vmem [resolvable:$true] %s76_s24  ;;  %s123_s4 = int_to_ptr.hbm [resolvable:$true] %s122_s4 }
   0xf   :  { %79 = dma.hbm_to_vmem [thread:$0]  %s75_s21, 16, %s77_s24, [#allocation9]  }
  0x10   :  { %s47_s30 = sshll.u32 %s1560_s29, 4  ;;  %s1274_s0 = smov [#allocation11]   ;;  %s48_s30 = int_to_ptr.hbm [resolvable:$true] %s47_s30 }
  0x11   :  { %55 = dma.hbm_to_vmem [thread:$0]  %s48_s30, 256, %s50_s19, [#allocation6], %s1555_s22, %s1555_s22, %s1272_s2  }
  0x12   :  { %s100_s1 = sshll.u32 %s1274_s0, 4  ;;  %s1275_s30 = smov [#allocation14]   ;;  %s101_s1 = int_to_ptr.vmem [resolvable:$true] %s100_s1 }
  0x13   :  { %103 = dma.hbm_to_vmem [thread:$0]  %s99_s27, 16, %s101_s1, [#allocation12]  }
  0x14   :  { %s124_s19 = sshll.u32 %s1275_s30, 4  ;;  %s151_s22 = sshll.u32 %s1552_s16, 4  ;;  %s125_s19 = int_to_ptr.vmem [resolvable:$true] %s124_s19  ;;  %s152_s22 = int_to_ptr.hbm [resolvable:$true] %s151_s22 }
  0x15   :  { %127 = dma.hbm_to_vmem [thread:$0]  %s123_s4, 16, %s125_s19, [#allocation15]  }
  0x16   :  { %s1561_s24 = sld [smem:[#allocation28_spill]]  ;;  %s1276_s26 = smov [#allocation17]  }
  0x17   :  { %s153_s10 = sshll.u32 %s1276_s26, 4  ;;  %s1562_s28 = smov 128   ;;  %s154_s10 = int_to_ptr.vmem [resolvable:$true] %s153_s10 }
  0x18   :  { %159 = dma.hbm_to_vmem [thread:$0]  %s152_s22, 512, %s154_s10, [#allocation18], %s1562_s28, %s1562_s28, %s1272_s2  }
  0x19   :  { %s1277_s27 = smov [#allocation2]   ;;  %s63_s16 = sshll.u32 %s1539_s3, 4  ;;  %s64_s16 = int_to_ptr.hbm [resolvable:$true] %s63_s16 }
  0x1a   :  { %s36_s29 = sshll.u32 %s1277_s27, 4  ;;  %s87_s19 = sshll.u32 %s1542_s6, 4  ;;  %s37_s29 = int_to_ptr.vmem [resolvable:$true] %s36_s29  ;;  %s88_s19 = int_to_ptr.hbm [resolvable:$true] %s87_s19 }
  0x1b   :  { %s1278_s20 = smov [#allocation7]   ;;  %s1279_s22 = smov [#allocation10]  }
  0x1c   :  { %s34_s25 = sshll.u32 %s1561_s24, 4  ;;  %s65_s23 = sshll.u32 %s1278_s20, 4  ;;  %s35_s25 = int_to_ptr.hbm [resolvable:$true] %s34_s25  ;;  %s66_s23 = int_to_ptr.vmem [resolvable:$true] %s65_s23 }
  0x1d   :  { %42 = dma.hbm_to_vmem [thread:$0]  %s35_s25, 256, %s37_s29, [#allocation3], %s1562_s28, %s1562_s28, %s1272_s2  }
  0x1e   :  { %68 = dma.hbm_to_vmem [thread:$0]  %s64_s16, 16, %s66_s23, [#allocation6]  }
  0x1f   :  { %s89_s7 = sshll.u32 %s1279_s22, 4  ;;  %s109_s3 = sshll.u32 %s1544_s8, 4  ;;  %s90_s7 = int_to_ptr.vmem [resolvable:$true] %s89_s7  ;;  %s110_s3 = int_to_ptr.hbm [resolvable:$true] %s109_s3 }
  0x20   :  { %92 = dma.hbm_to_vmem [thread:$0]  %s88_s19, 16, %s90_s7, [#allocation9]  }
  0x21   :  { %s135_s25 = sshll.u32 %s1548_s12, 4  ;;  %s1280_s10 = smov [#allocation13]   ;;  %s136_s25 = int_to_ptr.hbm [resolvable:$true] %s135_s25 }
  0x22   :  { %s111_s6 = sshll.u32 %s1280_s10, 4  ;;  %s1281_s28 = smov [#allocation16]   ;;  %s112_s6 = int_to_ptr.vmem [resolvable:$true] %s111_s6 }
  0x23   :  { %114 = dma.hbm_to_vmem [thread:$0]  %s110_s3, 16, %s112_s6, [#allocation12]  }
  0x24   :  { %s137_s27 = sshll.u32 %s1281_s28, 4  ;;  %s165_s1 = sshll.u32 %s1553_s17, 4  ;;  %s138_s27 = int_to_ptr.vmem [resolvable:$true] %s137_s27  ;;  %s166_s1 = int_to_ptr.hbm [resolvable:$true] %s165_s1 }
  0x25   :  { %140 = dma.hbm_to_vmem [thread:$0]  %s136_s25, 16, %s138_s27, [#allocation15]  }
  0x26   :  { %s1282_s8 = smov [#allocation19]  }
  0x27   :  { %s167_s16 = sshll.u32 %s1282_s8, 4  ;;  %s168_s16 = int_to_ptr.vmem [resolvable:$true] %s167_s16 }
  0x28   :  { %170 = dma.hbm_to_vmem [thread:$0]  %s166_s1, 16, %s168_s16, [#allocation18]  }
  0x29   :  { %1256 = dma.done.wait [#allocation3], 256  }
  0x2a   :  { %1257 = vsyncadd [#allocation3], 4294967040 }
  0x2b   :  { %1258 = dma.done.wait [#allocation6], 272  }
  0x2c   :  { %1259 = vsyncadd [#allocation6], 4294967024 }
  0x2d   :  { %1260 = dma.done.wait [#allocation9], 32  }
  0x2e   :  { %1261 = vsyncadd [#allocation9], 4294967264 }
  0x2f   :  { %1262 = dma.done.wait [#allocation12], 32  }
  0x30   :  { %1263 = vsyncadd [#allocation12], 4294967264 }
  0x31   :  { %1264 = dma.done.wait [#allocation15], 32  }
  0x32   :  { %1265 = vsyncadd [#allocation15], 4294967264 }
  0x33   :  { %1266 = dma.done.wait [#allocation18], 528  }
  0x34   :  { %1267 = vsyncadd [#allocation18], 4294966768  ;;  %v218_v0 = vld [vmem:[#allocation5 + $0x8] sm:$0xff]  ;;  %v217_v1 = vld [vmem:[#allocation5] sm:$0xff]  ;;  %vm223_vm0 = vcmask 130048   ;;  %s1563_s4 = sld [smem:[#allocation30_spill]] }
  0x35   :  { %244 = vmatpush.msra.mxu0 %v218_v0  ;;  %v215_v2 = vld [vmem:[#allocation2] sm:$0xff]  ;;  %v216_v3 = vld [vmem:[#allocation2 + $0x8] sm:$0xff]  ;;  %vm253_vm1 = vcmask 261120   ;;  %v1283_v11 = vmov 32.0   ;;  %v372_v28 = vld [vmem:[%s1541_s5 + $0x18] sm:$0xff]  ;;  %s1286_s3 = smov 64  }
  0x36   :  { %926 = vrcp.f32 %v1283_v11  ;;  %v371_v29 = vld [vmem:[%s1541_s5 + $0x10] sm:$0xff]  ;;  %395 = vmatpush.msra.mxu1 %v372_v28  ;;  %v370_v32 = vld [vmem:[%s1541_s5 + $0x8] sm:$0xff]  ;;  %v369_v34 = vld [vmem:[%s1541_s5] sm:$0xff]  ;;  %s859_s5 = sshll.u32 %s1554_s18, 4  ;;  %s1287_s26 = smov 4   ;;  %s860_s5 = int_to_ptr.hbm [resolvable:$true] %s859_s5 }
  0x37   :  { %245 = vmatpush.msra.mxu0 %v217_v1  ;;  %v918_v46 = vld [vmem:[#allocation7] ss:$0 sm:$0xff]  ;;  %v919_v50 = vld [vmem:[#allocation8] ss:$0 sm:$0xff] }
  0x38   :  { %877 = vmatmul.msk.f32.vlgmr.msra.gmra.mxu0 %vm223_vm0, %v215_v2  ;;  %396 = vmatpush.msra.mxu1 %v371_v29 }
  0x3a   :  { %v917_v4 = vld [vmem:[%s1563_s4] ss:$0 sm:$0xff]  ;;  %397 = vmatpush.msra.mxu1 %v370_v32  ;;  %v1284_v32 = vmov -1.0  }
  0x3c   :  { %v927_v12 = vpop.eup %926  ;;  %398 = vmatpush.msra.mxu1 %v369_v34 }
  0x3d   :  { %v261_v13 = vmul.f32 32.0, %v927_v12  ;;  %vm265_vm2 = vweird.f32 %v927_v12 }
  0x3f   :  { %v262_v14 = vsub.f32 1.0, %v261_v13 }
  0x40   :  { %878 = vmatmul.msk.f32.gmra.mxu0 %vm223_vm0, %v216_v3 }
  0x41   :  { %v263_v15 = vmul.f32 %v927_v12, %v262_v14 }
  0x43   :  { %v264_v16 = vadd.f32 %v927_v12, %v263_v15 }
  0x45   :  { %v1432_v17 = vsel %vm265_vm2, %v927_v12, %v264_v16 }
  0xb5   :  { %v247_v5 = vpop.f32.mrf.mxu0 }
  0xb6   :  { %v248_v6 = vadd.f32 %v917_v4, %v247_v5 }
  0xb8   :  { %v254_v7 = vsel %vm253_vm1, %v248_v6, 0.0 }
  0xb9   :  { %255 = vadd.xlane.f32.xlu0 %v254_v7 }
  0xbd   :  { %v250_v8 = vpop.f32.mrf.mxu0 }
  0xbe   :  { %v251_v9 = vadd.f32 %v917_v4, %v250_v8 }
  0xc0   :  { %v257_v10 = vsel %vm253_vm1, %v251_v9, 0.0 }
  0xc1   :  { %258 = vadd.xlane.f32.xlu2 %v257_v10 }
 0x12c   :  { %v256_v18 = vpop.xlane.xlu0 %255 }
 0x12d   :  { %v267_v19 = vmul.f32 %v1432_v17, %v256_v18 }
 0x12f   :  { %v269_v20 = vsub.f32 %v248_v6, %v267_v19 }
 0x131   :  { %v271_v21 = vmul.f32 %v269_v20, %v269_v20 }
 0x133   :  { %v273_v22 = vsel %vm253_vm1, %v271_v21, 0.0 }
 0x134   :  { %v259_v23 = vpop.xlane.xlu2 %258  ;;  %274 = vadd.xlane.f32.xlu0 %v273_v22 }
 0x135   :  { %v268_v24 = vmul.f32 %v1432_v17, %v259_v23 }
 0x137   :  { %v270_v25 = vsub.f32 %v251_v9, %v268_v24 }
 0x139   :  { %v272_v26 = vmul.f32 %v270_v25, %v270_v25 }
 0x13b   :  { %v276_v27 = vsel %vm253_vm1, %v272_v26, 0.0 }
 0x13c   :  { %277 = vadd.xlane.f32.xlu2 %v276_v27 }
 0x1a7   :  { %v275_v30 = vpop.xlane.xlu0 %274 }
 0x1a8   :  { %v279_v31 = vmul.f32 %v275_v30, %v1432_v17 }
 0x1aa   :  { %v281_v33 = vadd.f32 1e-05, %v279_v31 }
 0x1ac   :  { %928 = vrsqrt.f32 %v281_v33  ;;  %vm289_vm4 = vweird.f32 %v281_v33 }
 0x1af   :  { %v278_v35 = vpop.xlane.xlu2 %277 }
 0x1b0   :  { %v280_v36 = vmul.f32 %v278_v35, %v1432_v17 }
 0x1b2   :  { %v929_v37 = vpop.eup %928  ;;  %v282_v38 = vadd.f32 1e-05, %v280_v36 }
 0x1b3   :  { %v284_v39 = vmul.f32 %v929_v37, %v281_v33  ;;  %vm290_vm3 = vweird.f32 %v929_v37 }
 0x1b4   :  { %930 = vrsqrt.f32 %v282_v38  ;;  %vm291_vm5 = vmor %vm289_vm4, %vm290_vm3  ;;  %vm299_vm6 = vweird.f32 %v282_v38 }
 0x1b5   :  { %v285_v40 = vmul.f32 %v929_v37, %v284_v39 }
 0x1b7   :  { %v286_v41 = vmul.f32 0.5, %v285_v40 }
 0x1b9   :  { %v287_v42 = vsub.f32 1.5, %v286_v41 }
 0x1ba   :  { %v931_v43 = vpop.eup %930 }
 0x1bb   :  { %v288_v44 = vmul.f32 %v929_v37, %v287_v42  ;;  %v294_v45 = vmul.f32 %v931_v43, %v282_v38  ;;  %vm300_vm7 = vweird.f32 %v931_v43 }
 0x1bc   :  { %vm301_vm8 = vmor %vm299_vm6, %vm300_vm7  ;;  %vm727_vm6 = vcmask 257024  }
 0x1bd   :  { %v292_v47 = vsel %vm291_vm5, %v929_v37, %v288_v44  ;;  %v295_v48 = vmul.f32 %v931_v43, %v294_v45  ;;  %vm624_vm5 = vcmask 64512  }
 0x1be   :  { %v303_v49 = vmul.f32 %v292_v47, %v269_v20 }
 0x1bf   :  { %v296_v51 = vmul.f32 0.5, %v295_v48  ;;  %v920_v48 = vld [vmem:[#allocation10] ss:$0 sm:$0xff] }
 0x1c0   :  { %v309_v52 = vmul.f32 %v918_v46, %v303_v49 }
 0x1c1   :  { %v297_v53 = vsub.f32 1.5, %v296_v51 }
 0x1c2   :  { %v315_v54 = vadd.f32 %v919_v50, %v309_v52 }
 0x1c3   :  { %v298_v55 = vmul.f32 %v931_v43, %v297_v53 }
 0x1c4   :  { %v319_v56 = vmul.f32 0.70710677, %v315_v54  ;;  %v317_v37 = vmul.f32 0.5, %v315_v54 }
 0x1c5   :  { %v302_v57 = vsel %vm301_vm8, %v931_v43, %v298_v55 }
 0x1c6   :  { %v304_v58 = vmul.f32 %v302_v57, %v270_v25  ;;  %v325_v59 = vand.u32 2147483647, %v319_v56  ;;  %vm321_vm9 = vcmp.ge.f32.partialorder %v319_v56, 0.0 }
 0x1c7   :  { %v323_v33 = vsel %vm321_vm9, 1.0, %v1284_v32 }
 0x1c8   :  { %v327_v60 = vmul.f32 0.3275911, %v325_v59  ;;  %v310_v61 = vmul.f32 %v918_v46, %v304_v58  ;;  %v351_v4 = vsub.f32 0.0, %v325_v59 }
 0x1ca   :  { %v329_v62 = vadd.f32 1.0, %v327_v60  ;;  %v316_v63 = vadd.f32 %v919_v50, %v310_v61  ;;  %v353_v8 = vmul.f32 %v351_v4, %v325_v59 }
 0x1cc   :  { %932 = vrcp.f32 %v329_v62  ;;  %v320_v0 = vmul.f32 0.70710677, %v316_v63  ;;  %v355_v13 = vmul.f32 1.442695, %v353_v8  ;;  %v318_v44 = vmul.f32 0.5, %v316_v63  ;;  %v552_v8 = vld [vmem:[%s1547_s11 + $0x8] sm:$0xff] }
 0x1ce   :  { %v326_v1 = vand.u32 2147483647, %v320_v0  ;;  %vm322_vm10 = vcmp.ge.f32.partialorder %v320_v0, 0.0 }
 0x1cf   :  { %v324_v42 = vsel %vm322_vm10, 1.0, %v1284_v32 }
 0x1d0   :  { %v328_v2 = vmul.f32 0.3275911, %v326_v1  ;;  %v352_v10 = vsub.f32 0.0, %v326_v1 }
 0x1d2   :  { %v933_v3 = vpop.eup %932  ;;  %v330_v5 = vadd.f32 1.0, %v328_v2  ;;  %v354_v16 = vmul.f32 %v352_v10, %v326_v1  ;;  %v517_v1 = vld [vmem:[%s1545_s9 + $0x18] sm:$0xff]  ;;  %v514_v10 = vld [vmem:[%s1545_s9] sm:$0xff] }
 0x1d3   :  { %v333_v6 = vmul.f32 1.0614054, %v933_v3  ;;  %v554_v2 = vld [vmem:[%s1547_s11 + $0x18] sm:$0xff]  ;;  %540 = vmatpush.msra.mxu2 %v517_v1 }
 0x1d4   :  { %934 = vrcp.f32 %v330_v5  ;;  %v357_v22 = vmul.f32 1.442695, %v354_v16  ;;  %571 = vmatpush.msra.mxu3 %v554_v2  ;;  %v553_v5 = vld [vmem:[%s1547_s11 + $0x10] sm:$0xff] }
 0x1d5   :  { %v335_v7 = vadd.f32 -1.4531521, %v333_v6  ;;  %936 = vpow2.f32 %v355_v13 }
 0x1d6   :  { %938 = vpow2.f32 %v357_v22  ;;  %572 = vmatpush.msra.mxu3 %v553_v5 }
 0x1d7   :  { %v337_v9 = vmul.f32 %v933_v3, %v335_v7  ;;  %v515_v7 = vld [vmem:[%s1545_s9 + $0x8] sm:$0xff] }
 0x1d8   :  { %573 = vmatpush.msra.mxu3 %v552_v8 }
 0x1d9   :  { %v339_v11 = vadd.f32 1.4214138, %v337_v9 }
 0x1da   :  { %v935_v12 = vpop.eup %934 }
 0x1db   :  { %v341_v14 = vmul.f32 %v933_v3, %v339_v11  ;;  %v334_v15 = vmul.f32 1.0614054, %v935_v12  ;;  %v937_v27 = vpop.eup %936  ;;  %v551_v11 = vld [vmem:[%s1547_s11] sm:$0xff] }
 0x1dc   :  { %v939_v36 = vpop.eup %938  ;;  %574 = vmatpush.msra.mxu3 %v551_v11 }
 0x1dd   :  { %v343_v18 = vadd.f32 -0.28449672, %v341_v14  ;;  %v336_v19 = vadd.f32 -1.4531521, %v334_v15 }
 0x1df   :  { %v345_v20 = vmul.f32 %v933_v3, %v343_v18  ;;  %v338_v21 = vmul.f32 %v935_v12, %v336_v19 }
 0x1e1   :  { %v347_v23 = vadd.f32 0.2548296, %v345_v20  ;;  %v340_v24 = vadd.f32 1.4214138, %v338_v21 }
 0x1e3   :  { %v349_v25 = vmul.f32 %v933_v3, %v347_v23  ;;  %v342_v26 = vmul.f32 %v935_v12, %v340_v24  ;;  %v516_v3 = vld [vmem:[%s1545_s9 + $0x10] sm:$0xff]  ;;  %v921_v24 = vld [vmem:[#allocation11] ss:$0 sm:$0xff] }
 0x1e4   :  { %541 = vmatpush.msra.mxu2 %v516_v3 }
 0x1e5   :  { %v359_v28 = vmul.f32 %v937_v27, %v349_v25  ;;  %v344_v29 = vadd.f32 -0.28449672, %v342_v26 }
 0x1e6   :  { %542 = vmatpush.msra.mxu2 %v515_v7 }
 0x1e7   :  { %v361_v30 = vsub.f32 1.0, %v359_v28  ;;  %v346_v31 = vmul.f32 %v935_v12, %v344_v29  ;;  %v922_v28 = vld [vmem:[#allocation13] ss:$0 sm:$0xff] }
 0x1e8   :  { %543 = vmatpush.msra.mxu2 %v514_v10 }
 0x1e9   :  { %v363_v34 = vmul.f32 %v361_v30, %v323_v33  ;;  %v348_v35 = vadd.f32 0.2548296, %v346_v31 }
 0x1eb   :  { %v365_v38 = vadd.f32 1.0, %v363_v34  ;;  %v350_v39 = vmul.f32 %v935_v12, %v348_v35 }
 0x1ed   :  { %v367_v40 = vmul.f32 %v365_v38, %v317_v37  ;;  %v360_v41 = vmul.f32 %v939_v36, %v350_v39 }
 0x1ef   :  { %879 = vmatmul.msk.f32.vlgmr.msra.gmra.mxu1 %vm253_vm1, %v367_v40  ;;  %v362_v43 = vsub.f32 1.0, %v360_v41 }
 0x1f1   :  { %v364_v45 = vmul.f32 %v362_v43, %v324_v42 }
 0x1f3   :  { %v366_v46 = vadd.f32 1.0, %v364_v45 }
 0x1f5   :  { %v368_v47 = vmul.f32 %v366_v46, %v318_v44 }
 0x1f7   :  { %880 = vmatmul.msk.f32.gmra.mxu1 %vm253_vm1, %v368_v47 }
 0x26c   :  { %v400_v49 = vpop.f32.mrf.mxu1 }
 0x26d   :  { %v401_v50 = vadd.f32 %v920_v48, %v400_v49 }
 0x26f   :  { %v406_v51 = vsel %vm253_vm1, %v401_v50, 0.0 }
 0x270   :  { %407 = vadd.xlane.f32.xlu1 %v406_v51 }
 0x274   :  { %v403_v52 = vpop.f32.mrf.mxu1 }
 0x275   :  { %v404_v53 = vadd.f32 %v920_v48, %v403_v52 }
 0x277   :  { %v409_v54 = vsel %vm253_vm1, %v404_v53, 0.0 }
 0x278   :  { %410 = vadd.xlane.f32.xlu0 %v409_v54 }
 0x2e3   :  { %v408_v55 = vpop.xlane.xlu1 %407 }
 0x2e4   :  { %v412_v56 = vmul.f32 %v408_v55, %v1432_v17 }
 0x2e6   :  { %v414_v57 = vsub.f32 %v401_v50, %v412_v56 }
 0x2e8   :  { %v416_v58 = vmul.f32 %v414_v57, %v414_v57 }
 0x2ea   :  { %v418_v59 = vsel %vm253_vm1, %v416_v58, 0.0 }
 0x2eb   :  { %v411_v60 = vpop.xlane.xlu0 %410  ;;  %419 = vadd.xlane.f32.xlu1 %v418_v59 }
 0x2ec   :  { %v413_v61 = vmul.f32 %v411_v60, %v1432_v17 }
 0x2ee   :  { %v415_v62 = vsub.f32 %v404_v53, %v413_v61 }
 0x2f0   :  { %v417_v63 = vmul.f32 %v415_v62, %v415_v62 }
 0x2f2   :  { %v421_v0 = vsel %vm253_vm1, %v417_v63, 0.0 }
 0x2f3   :  { %422 = vadd.xlane.f32.xlu1 %v421_v0 }
 0x35e   :  { %v420_v4 = vpop.xlane.xlu1 %419 }
 0x35f   :  { %v424_v6 = vmul.f32 %v420_v4, %v1432_v17 }
 0x361   :  { %v426_v9 = vadd.f32 1e-05, %v424_v6 }
 0x363   :  { %940 = vrsqrt.f32 %v426_v9  ;;  %vm434_vm12 = vweird.f32 %v426_v9 }
 0x366   :  { %v423_v12 = vpop.xlane.xlu1 %422 }
 0x367   :  { %v425_v13 = vmul.f32 %v423_v12, %v1432_v17 }
 0x369   :  { %v941_v14 = vpop.eup %940  ;;  %v427_v15 = vadd.f32 1e-05, %v425_v13 }
 0x36a   :  { %v429_v16 = vmul.f32 %v941_v14, %v426_v9  ;;  %vm435_vm11 = vweird.f32 %v941_v14 }
 0x36b   :  { %942 = vrsqrt.f32 %v427_v15  ;;  %vm436_vm13 = vmor %vm434_vm12, %vm435_vm11  ;;  %vm444_vm14 = vweird.f32 %v427_v15 }
 0x36c   :  { %v430_v18 = vmul.f32 %v941_v14, %v429_v16 }
 0x36e   :  { %v431_v19 = vmul.f32 0.5, %v430_v18 }
 0x370   :  { %v432_v20 = vsub.f32 1.5, %v431_v19 }
 0x371   :  { %v943_v21 = vpop.eup %942 }
 0x372   :  { %v433_v22 = vmul.f32 %v941_v14, %v432_v20  ;;  %v439_v23 = vmul.f32 %v943_v21, %v427_v15  ;;  %vm445_vm15 = vweird.f32 %v943_v21 }
 0x373   :  { %vm446_vm2 = vmor %vm444_vm14, %vm445_vm15 }
 0x374   :  { %v437_v25 = vsel %vm436_vm13, %v941_v14, %v433_v22  ;;  %v440_v26 = vmul.f32 %v943_v21, %v439_v23 }
 0x375   :  { %v448_v27 = vmul.f32 %v437_v25, %v414_v57  ;;  %v590_v25 = vld [vmem:[#allocation17 + $0x18] sm:$0xff] }
 0x376   :  { %v441_v29 = vmul.f32 0.5, %v440_v26  ;;  %719 = vmatpush.msrb.mxu3 %v590_v25  ;;  %v589_v26 = vld [vmem:[#allocation17 + $0x10] sm:$0xff] }
 0x377   :  { %v454_v17 = vmul.f32 %v921_v24, %v448_v27  ;;  %v588_v27 = vld [vmem:[#allocation17 + $0x8] sm:$0xff] }
 0x378   :  { %v442_v30 = vsub.f32 1.5, %v441_v29  ;;  %720 = vmatpush.msrb.mxu3 %v589_v26  ;;  %v923_v29 = vld [vmem:[#allocation14] ss:$0 sm:$0xff] }
 0x379   :  { %v460_v31 = vadd.f32 %v922_v28, %v454_v17  ;;  %v924_v17 = vld [vmem:[#allocation16] ss:$0 sm:$0xff] }
 0x37a   :  { %v443_v33 = vmul.f32 %v943_v21, %v442_v30  ;;  %721 = vmatpush.msrb.mxu3 %v588_v27 }
 0x37b   :  { %v464_v34 = vmul.f32 0.70710677, %v460_v31  ;;  %v462_v12 = vmul.f32 0.5, %v460_v31 }
 0x37c   :  { %v447_v35 = vsel %vm446_vm2, %v943_v21, %v443_v33 }
 0x37d   :  { %v449_v36 = vmul.f32 %v447_v35, %v415_v62  ;;  %v470_v37 = vand.u32 2147483647, %v464_v34  ;;  %vm466_vm3 = vcmp.ge.f32.partialorder %v464_v34, 0.0  ;;  %v582_v34 = vld [vmem:[%s1549_s13] sm:$0xff] }
 0x37e   :  { %v468_v9 = vsel %vm466_vm3, 1.0, %v1284_v32 }
 0x37f   :  { %v472_v38 = vmul.f32 0.3275911, %v470_v37  ;;  %v455_v39 = vmul.f32 %v921_v24, %v449_v36  ;;  %v496_v46 = vsub.f32 0.0, %v470_v37 }
 0x381   :  { %v474_v40 = vadd.f32 1.0, %v472_v38  ;;  %v461_v41 = vadd.f32 %v922_v28, %v455_v39  ;;  %v498_v50 = vmul.f32 %v496_v46, %v470_v37  ;;  %v587_v28 = vld [vmem:[#allocation17] sm:$0xff] }
 0x382   :  { %722 = vmatpush.msrb.mxu3 %v587_v28  ;;  %v583_v37 = vld [vmem:[%s1549_s13 + $0x8] sm:$0xff] }
 0x383   :  { %944 = vrcp.f32 %v474_v40  ;;  %v465_v42 = vmul.f32 0.70710677, %v461_v41  ;;  %v500_v54 = vmul.f32 1.442695, %v498_v50  ;;  %v463_v22 = vmul.f32 0.5, %v461_v41 }
 0x385   :  { %v471_v43 = vand.u32 2147483647, %v465_v42  ;;  %vm467_vm4 = vcmp.ge.f32.partialorder %v465_v42, 0.0 }
 0x386   :  { %v469_v20 = vsel %vm467_vm4, 1.0, %v1284_v32 }
 0x387   :  { %v473_v44 = vmul.f32 0.3275911, %v471_v43  ;;  %v497_v55 = vsub.f32 0.0, %v471_v43 }
 0x389   :  { %v945_v45 = vpop.eup %944  ;;  %v475_v47 = vadd.f32 1.0, %v473_v44  ;;  %v499_v60 = vmul.f32 %v497_v55, %v471_v43 }
 0x38a   :  { %v478_v48 = vmul.f32 1.0614054, %v945_v45 }
 0x38b   :  { %946 = vrcp.f32 %v475_v47  ;;  %v502_v1 = vmul.f32 1.442695, %v499_v60  ;;  %v584_v60 = vld [vmem:[%s1550_s14] sm:$0xff] }
 0x38c   :  { %v480_v49 = vadd.f32 -1.4531521, %v478_v48  ;;  %948 = vpow2.f32 %v500_v54 }
 0x38d   :  { %950 = vpow2.f32 %v502_v1  ;;  %v586_v1 = vld [vmem:[%s1551_s15] sm:$0xf] }
 0x38e   :  { %v482_v51 = vmul.f32 %v945_v45, %v480_v49 }
 0x390   :  { %v484_v52 = vadd.f32 1.4214138, %v482_v51 }
 0x391   :  { %v947_v53 = vpop.eup %946 }
 0x392   :  { %v486_v56 = vmul.f32 %v945_v45, %v484_v52  ;;  %v479_v57 = vmul.f32 1.0614054, %v947_v53  ;;  %v949_v4 = vpop.eup %948 }
 0x393   :  { %v951_v15 = vpop.eup %950 }
 0x394   :  { %v488_v58 = vadd.f32 -0.28449672, %v486_v56  ;;  %v481_v59 = vadd.f32 -1.4531521, %v479_v57 }
 0x396   :  { %v490_v61 = vmul.f32 %v945_v45, %v488_v58  ;;  %v483_v62 = vmul.f32 %v947_v53, %v481_v59  ;;  %v585_v59 = vld [vmem:[%s1550_s14 + $0x8] sm:$0xff]  ;;  %s1285_s14 = smov [#allocation20]  }
 0x397   :  { %s857_s15 = sshll.u32 %s1285_s14, 4  ;;  %s858_s15 = int_to_ptr.vmem [resolvable:$true] %s857_s15 }
 0x398   :  { %v492_v63 = vadd.f32 0.2548296, %v490_v61  ;;  %v485_v0 = vadd.f32 1.4214138, %v483_v62 }
 0x39a   :  { %v494_v2 = vmul.f32 %v945_v45, %v492_v63  ;;  %v487_v3 = vmul.f32 %v947_v53, %v485_v0 }
 0x39c   :  { %v504_v5 = vmul.f32 %v949_v4, %v494_v2  ;;  %v489_v6 = vadd.f32 -0.28449672, %v487_v3 }
 0x39e   :  { %v506_v7 = vsub.f32 1.0, %v504_v5  ;;  %v491_v8 = vmul.f32 %v947_v53, %v489_v6 }
 0x3a0   :  { %v508_v10 = vmul.f32 %v506_v7, %v468_v9  ;;  %v493_v11 = vadd.f32 0.2548296, %v491_v8 }
 0x3a2   :  { %v510_v13 = vadd.f32 1.0, %v508_v10  ;;  %v495_v14 = vmul.f32 %v947_v53, %v493_v11  ;;  %v925_v11 = vld [vmem:[#allocation19] ss:$0 sm:$0xff] }
 0x3a4   :  { %v512_v16 = vmul.f32 %v510_v13, %v462_v12  ;;  %v505_v18 = vmul.f32 %v951_v15, %v495_v14 }
 0x3a6   :  { %881 = vmatmul.msk.f32.vlgmr.msra.gmra.mxu2 %vm253_vm1, %v512_v16  ;;  %883 = vmatmul.msk.f32.vlgmr.msra.gmra.mxu3 %vm253_vm1, %v512_v16  ;;  %v507_v19 = vsub.f32 1.0, %v505_v18 }
 0x3a8   :  { %v509_v21 = vmul.f32 %v507_v19, %v469_v20 }
 0x3aa   :  { %v511_v23 = vadd.f32 1.0, %v509_v21 }
 0x3ac   :  { %v513_v24 = vmul.f32 %v511_v23, %v463_v22 }
 0x3ae   :  { %882 = vmatmul.msk.f32.gmra.mxu2 %vm253_vm1, %v513_v24  ;;  %884 = vmatmul.msk.f32.gmra.mxu3 %vm253_vm1, %v513_v24 }
 0x429   :  { %v545_v30 = vpop.f32.mrf.mxu2  ;;  %v576_v32 = vpop.f32.mrf.mxu3 }
 0x42a   :  { %v546_v31 = vadd.f32 %v923_v29, %v545_v30  ;;  %v577_v33 = vadd.f32 %v924_v17, %v576_v32 }
 0x42c   :  { %885 = vmatpush.xpose.msk.msrb.mxu0 %vm253_vm1, %v546_v31  ;;  %668 = vmatpush.msrb.mxu1 %v577_v33 }
 0x42e   :  { %843 = vmatpush.msra.mxu1 %v590_v25 }
 0x42f   :  { %886 = vmatmul.msk.f32.vlgmr.msrb.gmra.mxu0 %vm253_vm1, %v582_v34 }
 0x430   :  { %844 = vmatpush.msra.mxu1 %v589_v26 }
 0x431   :  { %v579_v35 = vpop.f32.mrf.mxu3  ;;  %v548_v63 = vpop.f32.mrf.mxu2 }
 0x432   :  { %845 = vmatpush.msra.mxu1 %v588_v27  ;;  %v580_v36 = vadd.f32 %v924_v17, %v579_v35  ;;  %v549_v2 = vadd.f32 %v923_v29, %v548_v63 }
 0x434   :  { %846 = vmatpush.msra.mxu1 %v587_v28  ;;  %798 = vmatpush.msra.mxu3 %v580_v36 }
 0x437   :  { %887 = vmatmul.msk.f32.gmra.mxu0 %vm253_vm1, %v583_v37 }
 0x4ac   :  { %v618_v38 = vpop.f32.mrf.mxu0 }
 0x4ad   :  { %v625_v39 = vsel %vm624_vm5, %v618_v38, -inf }
 0x4ae   :  { %626 = vmax.xlane.f32.xlu2 %v625_v39 }
 0x4b4   :  { %v621_v40 = vpop.f32.mrf.mxu0 }
 0x4b5   :  { %v628_v41 = vsel %vm624_vm5, %v621_v40, -inf }
 0x4b6   :  { %629 = vmax.xlane.f32.xlu0 %v628_v41 }
 0x521   :  { %v627_v42 = vpop.xlane.xlu2 %626 }
 0x522   :  { %v631_v43 = vsub.f32 %v618_v38, %v627_v42 }
 0x524   :  { %v633_v44 = vmul.f32 1.442695, %v631_v43 }
 0x526   :  { %952 = vpow2.f32 %v633_v44 }
 0x529   :  { %v630_v45 = vpop.xlane.xlu0 %629 }
 0x52a   :  { %v632_v46 = vsub.f32 %v621_v40, %v630_v45 }
 0x52c   :  { %v953_v47 = vpop.eup %952  ;;  %v635_v48 = vmul.f32 1.442695, %v632_v46 }
 0x52d   :  { %v637_v49 = vsel %vm624_vm5, %v953_v47, 0.0 }
 0x52e   :  { %954 = vpow2.f32 %v635_v48  ;;  %638 = vadd.xlane.f32.xlu1 %v637_v49 }
 0x534   :  { %v955_v50 = vpop.eup %954 }
 0x535   :  { %v640_v51 = vsel %vm624_vm5, %v955_v50, 0.0 }
 0x536   :  { %641 = vadd.xlane.f32.xlu2 %v640_v51 }
 0x5a1   :  { %v639_v52 = vpop.xlane.xlu1 %638 }
 0x5a2   :  { %956 = vrcp.f32 %v639_v52 }
 0x5a8   :  { %v957_v53 = vpop.eup %956 }
 0x5a9   :  { %v642_v54 = vpop.xlane.xlu2 %641  ;;  %v645_v55 = vmul.f32 %v957_v53, %v953_v47 }
 0x5aa   :  { %958 = vrcp.f32 %v642_v54 }
 0x5ab   :  { %888 = vmatmul.msk.f32.vlgmr.msrb.gmra.mxu1 %vm624_vm5, %v645_v55 }
 0x5b0   :  { %v959_v56 = vpop.eup %958 }
 0x5b1   :  { %v646_v57 = vmul.f32 %v959_v56, %v955_v50 }
 0x5b3   :  { %889 = vmatmul.msk.f32.gmra.mxu1 %vm624_vm5, %v646_v57 }
 0x628   :  { %v670_v58 = vpop.f32.mrf.mxu1 }
 0x629   :  { %v676_v0 = vmul.f32 %v670_v58, %v584_v60 }
 0x630   :  { %v673_v61 = vpop.f32.mrf.mxu1 }
 0x631   :  { %v677_v62 = vmul.f32 %v673_v61, %v585_v59 }
 0x633   :  { %695 = vmatpush.msrb.mxu2 %v677_v62 }
 0x635   :  { %696 = vmatpush.msrb.mxu2 %v676_v0 }
 0x636   :  { %890 = vmatmul.msk.f32.vlgmr.msrb.gmra.mxu2 %vm223_vm0, %v586_v1 }
 0x637   :  { %892 = vmatpush.xpose.msk.msra.mxu2 %vm253_vm1, %v549_v2 }
 0x63e   :  { %893 = vmatmul.msk.f32.vlgmr.msra.gmra.mxu2 %vm253_vm1, %v582_v34 }
 0x646   :  { %894 = vmatmul.msk.f32.gmra.mxu2 %vm253_vm1, %v583_v37 }
 0x6b9   :  { %v698_v3 = vpop.f32.mrf.mxu2 }
 0x6ba   :  { %891 = vmatmul.msk.f32.vlgmr.msrb.gmra.mxu3 %vm253_vm1, %v698_v3 }
 0x6c1   :  { %v749_v4 = vpop.f32.mrf.mxu2 }
 0x6c2   :  { %v755_v5 = vsel %vm624_vm5, %v749_v4, -inf }
 0x6c3   :  { %756 = vmax.xlane.f32.xlu0 %v755_v5 }
 0x6c9   :  { %v752_v6 = vpop.f32.mrf.mxu2 }
 0x6ca   :  { %v758_v7 = vsel %vm624_vm5, %v752_v6, -inf }
 0x6cb   :  { %759 = vmax.xlane.f32.xlu1 %v758_v7 }
 0x736   :  { %v757_v8 = vpop.xlane.xlu0 %756 }
 0x737   :  { %v761_v9 = vsub.f32 %v749_v4, %v757_v8 }
 0x739   :  { %v763_v10 = vmul.f32 1.442695, %v761_v9 }
 0x73b   :  { %960 = vpow2.f32 %v763_v10 }
 0x73d   :  { %v724_v12 = vpop.f32.mrf.mxu3 }
 0x73e   :  { %v725_v13 = vadd.f32 %v925_v11, %v724_v12  ;;  %v760_v14 = vpop.xlane.xlu1 %759 }
 0x73f   :  { %v762_v15 = vsub.f32 %v752_v6, %v760_v14 }
 0x740   :  { %728 = vst.msk [vmem:[#allocation20] sm:$0xf] %vm727_vm6, %v725_v13 }
 0x741   :  { %v961_v16 = vpop.eup %960  ;;  %v765_v18 = vmul.f32 1.442695, %v762_v15 }
 0x742   :  { %v767_v19 = vsel %vm624_vm5, %v961_v16, 0.0 }
 0x743   :  { %962 = vpow2.f32 %v765_v18  ;;  %768 = vadd.xlane.f32.xlu2 %v767_v19 }
 0x749   :  { %v963_v20 = vpop.eup %962 }
 0x74a   :  { %v770_v21 = vsel %vm624_vm5, %v963_v20, 0.0 }
 0x74b   :  { %771 = vadd.xlane.f32.xlu0 %v770_v21 }
 0x7b6   :  { %v769_v22 = vpop.xlane.xlu2 %768 }
 0x7b7   :  { %964 = vrcp.f32 %v769_v22 }
 0x7bd   :  { %v965_v23 = vpop.eup %964 }
 0x7be   :  { %v775_v24 = vmul.f32 %v965_v23, %v961_v16  ;;  %v772_v25 = vpop.xlane.xlu0 %771 }
 0x7bf   :  { %966 = vrcp.f32 %v772_v25 }
 0x7c0   :  { %895 = vmatmul.msk.f32.vlgmr.msra.gmra.mxu3 %vm624_vm5, %v775_v24 }
 0x7c5   :  { %v967_v26 = vpop.eup %966 }
 0x7c6   :  { %v776_v27 = vmul.f32 %v967_v26, %v963_v20 }
 0x7c8   :  { %896 = vmatmul.msk.f32.gmra.mxu3 %vm624_vm5, %v776_v27 }
 0x843   :  { %v800_v28 = vpop.f32.mrf.mxu3 }
 0x844   :  { %v806_v30 = vmul.f32 %v800_v28, %v584_v60 }
 0x84b   :  { %v803_v29 = vpop.f32.mrf.mxu3 }
 0x84c   :  { %v807_v17 = vmul.f32 %v803_v29, %v585_v59 }
 0x84e   :  { %822 = vmatpush.msra.mxu0 %v807_v17 }
 0x850   :  { %823 = vmatpush.msra.mxu0 %v806_v30 }
 0x851   :  { %897 = vmatmul.msk.f32.vlgmr.msra.gmra.mxu0 %vm223_vm0, %v586_v1 }
 0x8ce   :  { %v825_v32 = vpop.f32.mrf.mxu0 }
 0x8cf   :  { %898 = vmatmul.msk.f32.vlgmr.msra.gmra.mxu1 %vm253_vm1, %v825_v32 }
 0x94c   :  { %v848_v31 = vpop.f32.mrf.mxu1 }
 0x94d   :  { %v849_v33 = vadd.f32 %v925_v11, %v848_v31 }
 0x94f   :  { %852 = vst.msk [vmem:[#allocation20 + $0x4] sm:$0xf] %vm727_vm6, %v849_v33 }
 0x950   :  { %865 = dma.vmem_to_hbm [thread:$0]  %s858_s15, 128, %s860_s5, [#allocation4], %s1286_s3, %s1286_s3, %s1287_s26  }
 0x951   :  { %1268 = dma.done.wait [#allocation4], 128  }
 0x952   :  { %1269 = vsyncadd [#allocation4], 4294967168 }
 0x953   :  { %870 = vsyncpa [#allocation3], 1 }
 0x954   :  { %871 = vsyncpa [#allocation6], 1 }
 0x955   :  { %872 = vsyncpa [#allocation9], 1 }
 0x956   :  { %873 = vsyncpa [#allocation12], 1 }
 0x957   :  { %874 = vsyncpa [#allocation15], 1 }
 0x958   :  { %875 = vsyncpa [#allocation18], 1 }
 0x959   :  { %876 = vsyncpa [#allocation4], 1 }

</bundles_post_ra>
